<compile_context>
chip_gen: v7x
topology: tpu7x:2x2x1
jax: 0.10.0
libtpu: 0.0.40
codegen_flags: <defaults>
</compile_context>

<pallas_src>
import numpy as np

import jax
import jax.numpy as jnp
from jax.experimental import pallas as pl
from jax.experimental.pallas import tpu as pltpu

BN_EPS = 1e-5
LANE = 128
SUBLANE_BF16 = 16   # bf16 packs 2 rows per sublane -> 16-row granularity


def _round_up(x, m):
    return (x + m - 1) // m * m


# ---------------------------------------------------------------------------
# Kernel
# ---------------------------------------------------------------------------
def _mgcmlp_kernel(
    x_ref,                                # [2, TILE_N, n_feat_p] compute dtype
    w1a_ref, b1a_ref, w2a_ref, b2a_ref,   # branch 0 (BN folded into w1/b1,
    w1b_ref, b1b_ref, w2b_ref, b2b_ref,   #  coffs folded into w2/b2)
    w3_ref, b3_ref, w4_ref, b4_ref,       # head
    out_ref,                              # [TILE_N, n_cls_p] (lane dense)
):
    def branch(x, w1, b1, w2, b2):
        # Linear(n_feat->n_hid) with eval-mode BatchNorm pre-folded, + ReLU.
        h = jnp.dot(x, w1[...], preferred_element_type=jnp.float32)
        h = jnp.maximum(h + b1[...], 0.0)
        # Linear(n_hid->n_hid) with coff pre-folded, + outer ReLU.
        h = jnp.dot(h.astype(w2.dtype), w2[...],
                    preferred_element_type=jnp.float32)
        return jnp.maximum(h + b2[...], 0.0)

    sumx = (branch(x_ref[0], w1a_ref, b1a_ref, w2a_ref, b2a_ref)
            + branch(x_ref[1], w1b_ref, b1b_ref, w2b_ref, b2b_ref))

    # linears[-2]: Linear(n_hid->n_hid) + ReLU
    h = jnp.dot(sumx.astype(w3_ref.dtype), w3_ref[...],
                preferred_element_type=jnp.float32)
    h = jnp.maximum(h + b3_ref[...], 0.0)

    # linears[-1]: Linear(n_hid->n_classes)  (classes padded to 128 lanes)
    out = jnp.dot(h.astype(w4_ref.dtype), w4_ref[...],
                  preferred_element_type=jnp.float32)
    out_ref[...] = (out + b4_ref[...]).astype(out_ref.dtype)


# ---------------------------------------------------------------------------
# Parameter preparation: BN fold, coffs fold, lane padding, bf16 cast.
# NOTE: host-side / prep-time only — do NOT call under jit.
# ---------------------------------------------------------------------------
def prepare_params(raw_params, coffs, *, compute_dtype=jnp.bfloat16):
    (w1a, b1a, ga, ba, mua, vara, w2a, b2a,
     w1b, b1b, gb, bb, mub, varb, w2b, b2b,
     w3, b3, w4, b4) = raw_params

    # coffs fold through ReLU is only valid for non-negative coffs
    # (the module fixes coffs = [0.95, 0.05], non-trainable).
    coffs_np = np.asarray(jax.device_get(coffs), dtype=np.float64)
    if not np.all(coffs_np >= 0):
        raise ValueError("coffs fold into w2/b2 requires non-negative coffs")

    n_feat, n_hid = w1a.shape
    n_classes = w4.shape[1]
    n_feat_p = _round_up(n_feat, LANE)
    n_hid_p = _round_up(n_hid, LANE)
    n_cls_p = _round_up(n_classes, LANE)

    def fold_bn(w1, b1, gamma, beta, mu, var):
        scale = gamma * jax.lax.rsqrt(var + BN_EPS)          # [1, n_hid]
        return w1 * scale, (b1 - mu) * scale + beta

    def pad_w(w, r, c):
        return jnp.pad(w, ((0, r - w.shape[0]), (0, c - w.shape[1])))

    def pad_b(b, c):
        return jnp.pad(b, ((0, 0), (0, c - b.shape[1])))

    def prep_branch(w1, b1, g, be, mu, var, w2, b2, coff):
        w1f, b1f = fold_bn(w1, b1, g, be, mu, var)
        w2f, b2f = coff * w2, coff * b2
        return (pad_w(w1f, n_feat_p, n_hid_p).astype(compute_dtype),
                pad_b(b1f, n_hid_p).astype(jnp.float32),
                pad_w(w2f, n_hid_p, n_hid_p).astype(compute_dtype),
                pad_b(b2f, n_hid_p).astype(jnp.float32))

    pa = prep_branch(w1a, b1a, ga, ba, mua, vara, w2a, b2a, float(coffs_np[0]))
    pb = prep_branch(w1b, b1b, gb, bb, mub, varb, w2b, b2b, float(coffs_np[1]))
    head = (pad_w(w3, n_hid_p, n_hid_p).astype(compute_dtype),
            pad_b(b3, n_hid_p).astype(jnp.float32),
            pad_w(w4, n_hid_p, n_cls_p).astype(compute_dtype),
            pad_b(b4, n_cls_p).astype(jnp.float32))

    return dict(params=pa + pb + head,
                n_feat=n_feat, n_hid=n_hid, n_classes=n_classes,
                n_feat_p=n_feat_p, n_hid_p=n_hid_p, n_cls_p=n_cls_p,
                compute_dtype=compute_dtype)


# ---------------------------------------------------------------------------
# Generation-aware VMEM capacity query
# ---------------------------------------------------------------------------
def _vmem_capacity_bytes():
    try:
        return int(pltpu.get_tpu_info().vmem_capacity_bytes)
    except Exception:
        pass
    try:
        kind = jax.devices()[0].device_kind.lower()
        if "v7" in kind:
            return 64 << 20
    except Exception:
        pass
    return 128 << 20


# ---------------------------------------------------------------------------
# Wrapper: batch-tiled pallas_call
# ---------------------------------------------------------------------------
def mgcmlp_forward(xs, prep, *, block_n=None, out_dtype=jnp.bfloat16):
    params = prep["params"]
    n_feat_p, n_hid_p, n_cls_p = prep["n_feat_p"], prep["n_hid_p"], prep["n_cls_p"]
    cdt = prep["compute_dtype"]

    n, n_feat = xs[0].shape
    in_itemsize = jnp.dtype(cdt).itemsize
    out_itemsize = jnp.dtype(out_dtype).itemsize
    param_bytes = sum(int(p.size) * p.dtype.itemsize for p in params)

    # --- Generation-aware caps / defaults -------------------------------
    vmem_cap = _vmem_capacity_bytes()
    big_vmem = vmem_cap >= (96 << 20)                 # v5e/v6e (128 MiB) vs v7x (64 MiB)
    vmem_cap_limit = (100 << 20) if big_vmem else (48 << 20)
    if block_n is None:
        block_n = 512 if big_vmem else 256

    def _vmem_budget(tile_n, param_mult):
        return int(param_mult * param_bytes
                   + 2 * 2 * tile_n * n_feat_p * in_itemsize   # stacked x, double-buffered
                   + 2 * tile_n * n_cls_p * out_itemsize       # output, double-buffered
                   + 8 * tile_n * n_hid_p * 4                  # f32 intermediates
                   + (4 << 20))                                 # Mosaic scratch headroom

    # --- Batch tile sizing ----------------------------------------------
    n16 = _round_up(n, SUBLANE_BF16)                  # bf16 sublane packing
    tile_n = _round_up(min(block_n, n16), SUBLANE_BF16)
    while tile_n > SUBLANE_BF16 and _vmem_budget(tile_n, 1) > vmem_cap_limit:
        tile_n = max(SUBLANE_BF16, _round_up(tile_n // 2, SUBLANE_BF16))
    # >= 2 grid steps (when the batch allows it) so the "parallel" axis can
    # shard across v7x's two TensorCores instead of idling one of them.
    if n16 // tile_n < 2 and n16 >= 2 * SUBLANE_BF16:
        tile_n = _round_up(-(-n16 // 2), SUBLANE_BF16)

    n_p = _round_up(n, tile_n)
    grid = (n_p // tile_n,)

    # --- Input prep: stack x0/x1 -> one DMA per grid step ---------------
    def prep_x(x):
        x = x.astype(cdt)
        return jnp.pad(x, ((0, n_p - n), (0, n_feat_p - n_feat)))

    x_stacked = jnp.stack([prep_x(xs[0]), prep_x(xs[1])], axis=0)

    x_spec = pl.BlockSpec((2, tile_n, n_feat_p), lambda i: (0, i, 0))
    out_spec = pl.BlockSpec((tile_n, n_cls_p), lambda i: (i, 0))

    flops = 2 * n_p * (2 * n_feat_p * n_hid_p + 3 * n_hid_p * n_hid_p
                       + n_hid_p * n_cls_p)
    bytes_accessed = (x_stacked.nbytes + param_bytes
                      + n_p * n_cls_p * out_itemsize)

    def _call(single_buffer_params):
        if single_buffer_params:
            # Constant index_map -> weights fetched once; double-buffering
            # them would only burn VMEM.
            param_specs = [pl.BlockSpec(p.shape, lambda i: (0, 0),
                                        pipeline_mode=pl.Buffered(1))
                           for p in params]
            param_mult = 1
        else:
            param_specs = [pl.BlockSpec(p.shape, lambda i: (0, 0))
                           for p in params]
            param_mult = 2
        vmem_bytes = min(_vmem_budget(tile_n, param_mult), vmem_cap_limit)

        return pl.pallas_call(
            _mgcmlp_kernel,
            out_shape=jax.ShapeDtypeStruct((n_p, n_cls_p), out_dtype),
            grid_spec=pltpu.PrefetchScalarGridSpec(
                num_scalar_prefetch=0,
                grid=grid,
                in_specs=[x_spec] + param_specs,
                out_specs=out_spec),
            compiler_params=pltpu.CompilerParams(
                dimension_semantics=("parallel",),
                vmem_limit_bytes=int(vmem_bytes)),
            cost_estimate=pl.CostEstimate(
                flops=int(flops), transcendentals=0,
                bytes_accessed=int(bytes_accessed)),
        )(x_stacked, *params)

    try:
        out_p = _call(single_buffer_params=True)
    except Exception:
        # Fallback for jax versions without pipeline_mode / Buffered(1).
        out_p = _call(single_buffer_params=False)

    return out_p[:n, :prep["n_classes"]]


# ---------------------------------------------------------------------------
# Raw-parameter init (mirrors the PyTorch module's shapes) + references
# ---------------------------------------------------------------------------
def init_raw_params(key, n_feat, n_hid, n_classes):
    """Linear weights stored [in, out]; biases / BN params stored [1, out]."""
    keys = jax.random.split(key, 8)
    k_it = iter(keys)

    def linear(kin, fan_in, fan_out, scale=None):
        s = scale if scale is not None else 1.0 / jnp.sqrt(fan_in)
        w = jax.random.normal(kin, (fan_in, fan_out), jnp.float32) * s
        b = jnp.zeros((1, fan_out), jnp.float32)
        return w, b

    params = []
    for _ in range(2):                               # steps = 2 branches
        w1, b1 = linear(next(k_it), n_feat, n_hid)
        gamma = jnp.ones((1, n_hid), jnp.float32)
        beta = jnp.zeros((1, n_hid), jnp.float32)
        mu = jnp.zeros((1, n_hid), jnp.float32)
        var = jnp.ones((1, n_hid), jnp.float32)
        w2, b2 = linear(next(k_it), n_hid, n_hid)
        params += [w1, b1, gamma, beta, mu, var, w2, b2]

    w3, b3 = linear(next(k_it), n_hid, n_hid)        # linears[-2]
    gain = jnp.sqrt(2.0)                             # linears[-1]: xavier_normal_
    xavier_std = gain * jnp.sqrt(2.0 / (n_hid + n_classes))
    w4, b4 = linear(next(k_it), n_hid, n_classes, scale=xavier_std)
    params += [w3, b3, w4, b4]
    return tuple(params)


def reference_forward_f32(xs, raw_params, coffs):
    """Exact eval-mode PyTorch semantics in f32 (unfolded, unpadded)."""
    (w1a, b1a, ga, ba, mua, vara, w2a, b2a,
     w1b, b1b, gb, bb, mub, varb, w2b, b2b,
     w3, b3, w4, b4) = raw_params

    def branch(x, w1, b1, g, be, mu, var, w2, b2):
        h = x @ w1 + b1
        h = (h - mu) * jax.lax.rsqrt(var + BN_EPS) * g + be
        h = jnp.maximum(h, 0.0)
        h = h @ w2 + b2
        return jnp.maximum(h, 0.0)

    s = (coffs[0] * branch(xs[0], w1a, b1a, ga, ba, mua, vara, w2a, b2a)
         + coffs[1] * branch(xs[1], w1b, b1b, gb, bb, mub, varb, w2b, b2b))
    h = jnp.maximum(s @ w3 + b3, 0.0)
    return h @ w4 + b4


def reference_forward_prepared(xs, prep):
    """Plain-JAX replica of the kernel math (folded/padded/bf16)."""
    (w1a, b1a, w2a, b2a, w1b, b1b, w2b, b2b, w3, b3, w4, b4) = prep["params"]
    cdt = prep["compute_dtype"]
    n_feat = xs[0].shape[1]

    def prep_x(x):
        x = x.astype(cdt)
        return jnp.pad(x, ((0, 0), (0, prep["n_feat_p"] - n_feat)))

    def branch(x, w1, b1, w2, b2):
        h = jnp.dot(x, w1, preferred_element_type=jnp.float32) + b1
        h = jnp.maximum(h, 0.0)
        h = jnp.dot(h.astype(cdt), w2, preferred_element_type=jnp.float32) + b2
        return jnp.maximum(h, 0.0)

    s = (branch(prep_x(xs[0]), w1a, b1a, w2a, b2a)
         + branch(prep_x(xs[1]), w1b, b1b, w2b, b2b))
    h = jnp.maximum(
        jnp.dot(s.astype(cdt), w3, preferred_element_type=jnp.float32) + b3, 0.0)
    out = jnp.dot(h.astype(cdt), w4, preferred_element_type=jnp.float32) + b4
    return out[:, :prep["n_classes"]]


if __name__ == "__main__":
    N, N_FEAT, N_HID, N_CLASSES = 16, 32, 32, 8

    key = jax.random.PRNGKey(0)
    kx0, kx1, kp = jax.random.split(key, 3)
    x0 = jax.random.normal(kx0, (N, N_FEAT), jnp.float32)
    x1 = jax.random.normal(kx1, (N, N_FEAT), jnp.float32)
    xs = (x0, x1)

    coffs = jnp.array([0.95, 0.05], dtype=jnp.float32)
    raw_params = init_raw_params(kp, N_FEAT, N_HID, N_CLASSES)
    prep = prepare_params(raw_params, coffs)     # bf16 matmul weights by default

    out = jax.block_until_ready(mgcmlp_forward(xs, prep))
    assert out.shape == (N, N_CLASSES), out.shape
    out_f32 = out.astype(jnp.float32)

    # Kernel vs. a plain-JAX replica using the exact same folded/bf16 params
    # (tolerance covers the bf16 output cast).
    ref_q = jax.block_until_ready(reference_forward_prepared(xs, prep))
    assert jnp.allclose(out_f32, ref_q, atol=2e-2, rtol=2e-2), float(
        jnp.max(jnp.abs(out_f32 - ref_q)))

    # Semantic check vs. full-f32 unfolded reference (tolerance covers bf16).
    ref_f32 = jax.block_until_ready(reference_forward_f32(xs, raw_params, coffs))
    assert jnp.allclose(out_f32, ref_f32, atol=1e-1, rtol=1e-1), float(
        jnp.max(jnp.abs(out_f32 - ref_f32)))

    print("KERNEL_OK")
</pallas_src>

<mosaic_0001>
module attributes {stable_mosaic.version = 11 : i64} {
  func.func @_mgcmlp_kernel(%arg0: i32, %arg1: memref<2x16x128xbf16, #tpu.memory_space<vmem>>, %arg2: memref<128x128xbf16, #tpu.memory_space<vmem>>, %arg3: memref<1x128xf32, #tpu.memory_space<vmem>>, %arg4: memref<128x128xbf16, #tpu.memory_space<vmem>>, %arg5: memref<1x128xf32, #tpu.memory_space<vmem>>, %arg6: memref<128x128xbf16, #tpu.memory_space<vmem>>, %arg7: memref<1x128xf32, #tpu.memory_space<vmem>>, %arg8: memref<128x128xbf16, #tpu.memory_space<vmem>>, %arg9: memref<1x128xf32, #tpu.memory_space<vmem>>, %arg10: memref<128x128xbf16, #tpu.memory_space<vmem>>, %arg11: memref<1x128xf32, #tpu.memory_space<vmem>>, %arg12: memref<128x128xbf16, #tpu.memory_space<vmem>>, %arg13: memref<1x128xf32, #tpu.memory_space<vmem>>, %arg14: memref<16x128xbf16, #tpu.memory_space<vmem>>) attributes {dimension_semantics = [#tpu.dimension_semantics<parallel>], iteration_bounds = array<i64: 1>, scalar_prefetch = 0 : i64, scratch_operands = 0 : i64, tpu.core_type = #tpu.core_type<tc>, window_params = [{transform_indices = @transform_0, window_bounds = array<i64: 2, 16, 128>}, {pipeline_mode = #tpu.pipeline_mode<synchronous>, transform_indices = @transform_1, window_bounds = array<i64: 128, 128>}, {pipeline_mode = #tpu.pipeline_mode<synchronous>, transform_indices = @transform_2, window_bounds = array<i64: 1, 128>}, {pipeline_mode = #tpu.pipeline_mode<synchronous>, transform_indices = @transform_3, window_bounds = array<i64: 128, 128>}, {pipeline_mode = #tpu.pipeline_mode<synchronous>, transform_indices = @transform_4, window_bounds = array<i64: 1, 128>}, {pipeline_mode = #tpu.pipeline_mode<synchronous>, transform_indices = @transform_5, window_bounds = array<i64: 128, 128>}, {pipeline_mode = #tpu.pipeline_mode<synchronous>, transform_indices = @transform_6, window_bounds = array<i64: 1, 128>}, {pipeline_mode = #tpu.pipeline_mode<synchronous>, transform_indices = @transform_7, window_bounds = array<i64: 128, 128>}, {pipeline_mode = #tpu.pipeline_mode<synchronous>, transform_indices = @transform_8, window_bounds = array<i64: 1, 128>}, {pipeline_mode = #tpu.pipeline_mode<synchronous>, transform_indices = @transform_9, window_bounds = array<i64: 128, 128>}, {pipeline_mode = #tpu.pipeline_mode<synchronous>, transform_indices = @transform_10, window_bounds = array<i64: 1, 128>}, {pipeline_mode = #tpu.pipeline_mode<synchronous>, transform_indices = @transform_11, window_bounds = array<i64: 128, 128>}, {pipeline_mode = #tpu.pipeline_mode<synchronous>, transform_indices = @transform_12, window_bounds = array<i64: 1, 128>}, {transform_indices = @transform_13, window_bounds = array<i64: 16, 128>}]} {
    %c0 = arith.constant 0 : index
    %c0_0 = arith.constant 0 : index
    %c0_1 = arith.constant 0 : index
    %0 = vector.load %arg1[%c0, %c0_0, %c0_1] : memref<2x16x128xbf16, #tpu.memory_space<vmem>>, vector<1x16x128xbf16>
    %1 = vector.shape_cast %0 : vector<1x16x128xbf16> to vector<16x128xbf16>
    %c0_2 = arith.constant 0 : index
    %c0_3 = arith.constant 0 : index
    %2 = vector.load %arg2[%c0_2, %c0_3] : memref<128x128xbf16, #tpu.memory_space<vmem>>, vector<128x128xbf16>
    %cst = arith.constant dense<0.000000e+00> : vector<16x128xf32>
    %3 = tpu.matmul %1, %2, %cst {dimension_numbers = #tpu.dot_dimension_numbers<[1], [0], [0], [1], [0, 0, 1, 1], [], []>} : vector<16x128xbf16>, vector<128x128xbf16>, vector<16x128xf32> -> vector<16x128xf32>
    %c0_4 = arith.constant 0 : index
    %c0_5 = arith.constant 0 : index
    %4 = vector.load %arg3[%c0_4, %c0_5] : memref<1x128xf32, #tpu.memory_space<vmem>>, vector<1x128xf32>
    %5 = vector.broadcast %4 : vector<1x128xf32> to vector<16x128xf32>
    %6 = arith.addf %3, %5 : vector<16x128xf32>
    %cst_6 = arith.constant 0.000000e+00 : f32
    %7 = vector.broadcast %cst_6 : f32 to vector<16x128xf32>
    %8 = arith.maximumf %6, %7 : vector<16x128xf32>
    %9 = arith.truncf %8 : vector<16x128xf32> to vector<16x128xbf16>
    %c0_7 = arith.constant 0 : index
    %c0_8 = arith.constant 0 : index
    %10 = vector.load %arg4[%c0_7, %c0_8] : memref<128x128xbf16, #tpu.memory_space<vmem>>, vector<128x128xbf16>
    %cst_9 = arith.constant dense<0.000000e+00> : vector<16x128xf32>
    %11 = tpu.matmul %9, %10, %cst_9 {dimension_numbers = #tpu.dot_dimension_numbers<[1], [0], [0], [1], [0, 0, 1, 1], [], []>} : vector<16x128xbf16>, vector<128x128xbf16>, vector<16x128xf32> -> vector<16x128xf32>
    %c0_10 = arith.constant 0 : index
    %c0_11 = arith.constant 0 : index
    %12 = vector.load %arg5[%c0_10, %c0_11] : memref<1x128xf32, #tpu.memory_space<vmem>>, vector<1x128xf32>
    %13 = vector.broadcast %12 : vector<1x128xf32> to vector<16x128xf32>
    %14 = arith.addf %11, %13 : vector<16x128xf32>
    %cst_12 = arith.constant 0.000000e+00 : f32
    %15 = vector.broadcast %cst_12 : f32 to vector<16x128xf32>
    %16 = arith.maximumf %14, %15 : vector<16x128xf32>
    %c1 = arith.constant 1 : index
    %c0_13 = arith.constant 0 : index
    %c0_14 = arith.constant 0 : index
    %17 = vector.load %arg1[%c1, %c0_13, %c0_14] : memref<2x16x128xbf16, #tpu.memory_space<vmem>>, vector<1x16x128xbf16>
    %18 = vector.shape_cast %17 : vector<1x16x128xbf16> to vector<16x128xbf16>
    %c0_15 = arith.constant 0 : index
    %c0_16 = arith.constant 0 : index
    %19 = vector.load %arg6[%c0_15, %c0_16] : memref<128x128xbf16, #tpu.memory_space<vmem>>, vector<128x128xbf16>
    %cst_17 = arith.constant dense<0.000000e+00> : vector<16x128xf32>
    %20 = tpu.matmul %18, %19, %cst_17 {dimension_numbers = #tpu.dot_dimension_numbers<[1], [0], [0], [1], [0, 0, 1, 1], [], []>} : vector<16x128xbf16>, vector<128x128xbf16>, vector<16x128xf32> -> vector<16x128xf32>
    %c0_18 = arith.constant 0 : index
    %c0_19 = arith.constant 0 : index
    %21 = vector.load %arg7[%c0_18, %c0_19] : memref<1x128xf32, #tpu.memory_space<vmem>>, vector<1x128xf32>
    %22 = vector.broadcast %21 : vector<1x128xf32> to vector<16x128xf32>
    %23 = arith.addf %20, %22 : vector<16x128xf32>
    %cst_20 = arith.constant 0.000000e+00 : f32
    %24 = vector.broadcast %cst_20 : f32 to vector<16x128xf32>
    %25 = arith.maximumf %23, %24 : vector<16x128xf32>
    %26 = arith.truncf %25 : vector<16x128xf32> to vector<16x128xbf16>
    %c0_21 = arith.constant 0 : index
    %c0_22 = arith.constant 0 : index
    %27 = vector.load %arg8[%c0_21, %c0_22] : memref<128x128xbf16, #tpu.memory_space<vmem>>, vector<128x128xbf16>
    %cst_23 = arith.constant dense<0.000000e+00> : vector<16x128xf32>
    %28 = tpu.matmul %26, %27, %cst_23 {dimension_numbers = #tpu.dot_dimension_numbers<[1], [0], [0], [1], [0, 0, 1, 1], [], []>} : vector<16x128xbf16>, vector<128x128xbf16>, vector<16x128xf32> -> vector<16x128xf32>
    %c0_24 = arith.constant 0 : index
    %c0_25 = arith.constant 0 : index
    %29 = vector.load %arg9[%c0_24, %c0_25] : memref<1x128xf32, #tpu.memory_space<vmem>>, vector<1x128xf32>
    %30 = vector.broadcast %29 : vector<1x128xf32> to vector<16x128xf32>
    %31 = arith.addf %28, %30 : vector<16x128xf32>
    %cst_26 = arith.constant 0.000000e+00 : f32
    %32 = vector.broadcast %cst_26 : f32 to vector<16x128xf32>
    %33 = arith.maximumf %31, %32 : vector<16x128xf32>
    %34 = arith.addf %16, %33 : vector<16x128xf32>
    %35 = arith.truncf %34 : vector<16x128xf32> to vector<16x128xbf16>
    %c0_27 = arith.constant 0 : index
    %c0_28 = arith.constant 0 : index
    %36 = vector.load %arg10[%c0_27, %c0_28] : memref<128x128xbf16, #tpu.memory_space<vmem>>, vector<128x128xbf16>
    %cst_29 = arith.constant dense<0.000000e+00> : vector<16x128xf32>
    %37 = tpu.matmul %35, %36, %cst_29 {dimension_numbers = #tpu.dot_dimension_numbers<[1], [0], [0], [1], [0, 0, 1, 1], [], []>} : vector<16x128xbf16>, vector<128x128xbf16>, vector<16x128xf32> -> vector<16x128xf32>
    %c0_30 = arith.constant 0 : index
    %c0_31 = arith.constant 0 : index
    %38 = vector.load %arg11[%c0_30, %c0_31] : memref<1x128xf32, #tpu.memory_space<vmem>>, vector<1x128xf32>
    %39 = vector.broadcast %38 : vector<1x128xf32> to vector<16x128xf32>
    %40 = arith.addf %37, %39 : vector<16x128xf32>
    %cst_32 = arith.constant 0.000000e+00 : f32
    %41 = vector.broadcast %cst_32 : f32 to vector<16x128xf32>
    %42 = arith.maximumf %40, %41 : vector<16x128xf32>
    %43 = arith.truncf %42 : vector<16x128xf32> to vector<16x128xbf16>
    %c0_33 = arith.constant 0 : index
    %c0_34 = arith.constant 0 : index
    %44 = vector.load %arg12[%c0_33, %c0_34] : memref<128x128xbf16, #tpu.memory_space<vmem>>, vector<128x128xbf16>
    %cst_35 = arith.constant dense<0.000000e+00> : vector<16x128xf32>
    %45 = tpu.matmul %43, %44, %cst_35 {dimension_numbers = #tpu.dot_dimension_numbers<[1], [0], [0], [1], [0, 0, 1, 1], [], []>} : vector<16x128xbf16>, vector<128x128xbf16>, vector<16x128xf32> -> vector<16x128xf32>
    %c0_36 = arith.constant 0 : index
    %c0_37 = arith.constant 0 : index
    %46 = vector.load %arg13[%c0_36, %c0_37] : memref<1x128xf32, #tpu.memory_space<vmem>>, vector<1x128xf32>
    %47 = vector.broadcast %46 : vector<1x128xf32> to vector<16x128xf32>
    %48 = arith.addf %45, %47 : vector<16x128xf32>
    %49 = arith.truncf %48 : vector<16x128xf32> to vector<16x128xbf16>
    %c0_38 = arith.constant 0 : index
    %c0_39 = arith.constant 0 : index
    %50 = vector.load %arg14[%c0_38, %c0_39] : memref<16x128xbf16, #tpu.memory_space<vmem>>, vector<16x128xbf16>
    tpu.vector_store %arg14[%c0_38, %c0_39], %49 {strides = array<i32>} : memref<16x128xbf16, #tpu.memory_space<vmem>>, vector<16x128xbf16>,
    return
  }
  func.func @transform_0(%arg0: i32) -> (i32, i32, i32) {
    %c0_i32 = arith.constant 0 : i32
    %c0_i32_0 = arith.constant 0 : i32
    %c0_i32_1 = arith.constant 0 : i32
    return %c0_i32, %arg0, %c0_i32_0 : i32, i32, i32
  }
  func.func @transform_1(%arg0: i32) -> (i32, i32) {
    %c0_i32 = arith.constant 0 : i32
    %c0_i32_0 = arith.constant 0 : i32
    %c0_i32_1 = arith.constant 0 : i32
    return %c0_i32, %c0_i32_0 : i32, i32
  }
  func.func @transform_2(%arg0: i32) -> (i32, i32) {
    %c0_i32 = arith.constant 0 : i32
    %c0_i32_0 = arith.constant 0 : i32
    %c0_i32_1 = arith.constant 0 : i32
    return %c0_i32, %c0_i32_0 : i32, i32
  }
  func.func @transform_3(%arg0: i32) -> (i32, i32) {
    %c0_i32 = arith.constant 0 : i32
    %c0_i32_0 = arith.constant 0 : i32
    %c0_i32_1 = arith.constant 0 : i32
    return %c0_i32, %c0_i32_0 : i32, i32
  }
  func.func @transform_4(%arg0: i32) -> (i32, i32) {
    %c0_i32 = arith.constant 0 : i32
    %c0_i32_0 = arith.constant 0 : i32
    %c0_i32_1 = arith.constant 0 : i32
    return %c0_i32, %c0_i32_0 : i32, i32
  }
  func.func @transform_5(%arg0: i32) -> (i32, i32) {
    %c0_i32 = arith.constant 0 : i32
    %c0_i32_0 = arith.constant 0 : i32
    %c0_i32_1 = arith.constant 0 : i32
    return %c0_i32, %c0_i32_0 : i32, i32
  }
  func.func @transform_6(%arg0: i32) -> (i32, i32) {
    %c0_i32 = arith.constant 0 : i32
    %c0_i32_0 = arith.constant 0 : i32
    %c0_i32_1 = arith.constant 0 : i32
    return %c0_i32, %c0_i32_0 : i32, i32
  }
  func.func @transform_7(%arg0: i32) -> (i32, i32) {
    %c0_i32 = arith.constant 0 : i32
    %c0_i32_0 = arith.constant 0 : i32
    %c0_i32_1 = arith.constant 0 : i32
    return %c0_i32, %c0_i32_0 : i32, i32
  }
  func.func @transform_8(%arg0: i32) -> (i32, i32) {
    %c0_i32 = arith.constant 0 : i32
    %c0_i32_0 = arith.constant 0 : i32
    %c0_i32_1 = arith.constant 0 : i32
    return %c0_i32, %c0_i32_0 : i32, i32
  }
  func.func @transform_9(%arg0: i32) -> (i32, i32) {
    %c0_i32 = arith.constant 0 : i32
    %c0_i32_0 = arith.constant 0 : i32
    %c0_i32_1 = arith.constant 0 : i32
    return %c0_i32, %c0_i32_0 : i32, i32
  }
  func.func @transform_10(%arg0: i32) -> (i32, i32) {
    %c0_i32 = arith.constant 0 : i32
    %c0_i32_0 = arith.constant 0 : i32
    %c0_i32_1 = arith.constant 0 : i32
    return %c0_i32, %c0_i32_0 : i32, i32
  }
  func.func @transform_11(%arg0: i32) -> (i32, i32) {
    %c0_i32 = arith.constant 0 : i32
    %c0_i32_0 = arith.constant 0 : i32
    %c0_i32_1 = arith.constant 0 : i32
    return %c0_i32, %c0_i32_0 : i32, i32
  }
  func.func @transform_12(%arg0: i32) -> (i32, i32) {
    %c0_i32 = arith.constant 0 : i32
    %c0_i32_0 = arith.constant 0 : i32
    %c0_i32_1 = arith.constant 0 : i32
    return %c0_i32, %c0_i32_0 : i32, i32
  }
  func.func @transform_13(%arg0: i32) -> (i32, i32) {
    %c0_i32 = arith.constant 0 : i32
    %c0_i32_0 = arith.constant 0 : i32
    return %arg0, %c0_i32 : i32, i32
  }
}

module attributes {stable_mosaic.version = 11 : i64} {
  func.func @_mgcmlp_kernel(%arg0: i32, %arg1: memref<2x16x128xbf16, #tpu.memory_space<vmem>>, %arg2: memref<128x128xbf16, #tpu.memory_space<vmem>>, %arg3: memref<1x128xf32, #tpu.memory_space<vmem>>, %arg4: memref<128x128xbf16, #tpu.memory_space<vmem>>, %arg5: memref<1x128xf32, #tpu.memory_space<vmem>>, %arg6: memref<128x128xbf16, #tpu.memory_space<vmem>>, %arg7: memref<1x128xf32, #tpu.memory_space<vmem>>, %arg8: memref<128x128xbf16, #tpu.memory_space<vmem>>, %arg9: memref<1x128xf32, #tpu.memory_space<vmem>>, %arg10: memref<128x128xbf16, #tpu.memory_space<vmem>>, %arg11: memref<1x128xf32, #tpu.memory_space<vmem>>, %arg12: memref<128x128xbf16, #tpu.memory_space<vmem>>, %arg13: memref<1x128xf32, #tpu.memory_space<vmem>>, %arg14: memref<16x128xbf16, #tpu.memory_space<vmem>>) attributes {dimension_semantics = [#tpu.dimension_semantics<parallel>], iteration_bounds = array<i64: 1>, scalar_prefetch = 0 : i64, scratch_operands = 0 : i64, tpu.core_type = #tpu.core_type<tc>, window_params = [{transform_indices = @transform_0, window_bounds = array<i64: 2, 16, 128>}, {pipeline_mode = #tpu.pipeline_mode<synchronous>, transform_indices = @transform_1, window_bounds = array<i64: 128, 128>}, {pipeline_mode = #tpu.pipeline_mode<synchronous>, transform_indices = @transform_2, window_bounds = array<i64: 1, 128>}, {pipeline_mode = #tpu.pipeline_mode<synchronous>, transform_indices = @transform_3, window_bounds = array<i64: 128, 128>}, {pipeline_mode = #tpu.pipeline_mode<synchronous>, transform_indices = @transform_4, window_bounds = array<i64: 1, 128>}, {pipeline_mode = #tpu.pipeline_mode<synchronous>, transform_indices = @transform_5, window_bounds = array<i64: 128, 128>}, {pipeline_mode = #tpu.pipeline_mode<synchronous>, transform_indices = @transform_6, window_bounds = array<i64: 1, 128>}, {pipeline_mode = #tpu.pipeline_mode<synchronous>, transform_indices = @transform_7, window_bounds = array<i64: 128, 128>}, {pipeline_mode = #tpu.pipeline_mode<synchronous>, transform_indices = @transform_8, window_bounds = array<i64: 1, 128>}, {pipeline_mode = #tpu.pipeline_mode<synchronous>, transform_indices = @transform_9, window_bounds = array<i64: 128, 128>}, {pipeline_mode = #tpu.pipeline_mode<synchronous>, transform_indices = @transform_10, window_bounds = array<i64: 1, 128>}, {pipeline_mode = #tpu.pipeline_mode<synchronous>, transform_indices = @transform_11, window_bounds = array<i64: 128, 128>}, {pipeline_mode = #tpu.pipeline_mode<synchronous>, transform_indices = @transform_12, window_bounds = array<i64: 1, 128>}, {transform_indices = @transform_13, window_bounds = array<i64: 16, 128>}]} {
    %c0 = arith.constant 0 : index
    %c0_0 = arith.constant 0 : index
    %c0_1 = arith.constant 0 : index
    %0 = vector.load %arg1[%c0, %c0_0, %c0_1] : memref<2x16x128xbf16, #tpu.memory_space<vmem>>, vector<1x16x128xbf16>
    %1 = vector.shape_cast %0 : vector<1x16x128xbf16> to vector<16x128xbf16>
    %c0_2 = arith.constant 0 : index
    %c0_3 = arith.constant 0 : index
    %2 = vector.load %arg2[%c0_2, %c0_3] : memref<128x128xbf16, #tpu.memory_space<vmem>>, vector<128x128xbf16>
    %cst = arith.constant dense<0.000000e+00> : vector<16x128xf32>
    %3 = tpu.matmul %1, %2, %cst {dimension_numbers = #tpu.dot_dimension_numbers<[1], [0], [0], [1], [0, 0, 1, 1], [], []>} : vector<16x128xbf16>, vector<128x128xbf16>, vector<16x128xf32> -> vector<16x128xf32>
    %c0_4 = arith.constant 0 : index
    %c0_5 = arith.constant 0 : index
    %4 = vector.load %arg3[%c0_4, %c0_5] : memref<1x128xf32, #tpu.memory_space<vmem>>, vector<1x128xf32>
    %5 = vector.broadcast %4 : vector<1x128xf32> to vector<16x128xf32>
    %6 = arith.addf %3, %5 : vector<16x128xf32>
    %cst_6 = arith.constant 0.000000e+00 : f32
    %7 = vector.broadcast %cst_6 : f32 to vector<16x128xf32>
    %8 = arith.maximumf %6, %7 : vector<16x128xf32>
    %9 = arith.truncf %8 : vector<16x128xf32> to vector<16x128xbf16>
    %c0_7 = arith.constant 0 : index
    %c0_8 = arith.constant 0 : index
    %10 = vector.load %arg4[%c0_7, %c0_8] : memref<128x128xbf16, #tpu.memory_space<vmem>>, vector<128x128xbf16>
    %cst_9 = arith.constant dense<0.000000e+00> : vector<16x128xf32>
    %11 = tpu.matmul %9, %10, %cst_9 {dimension_numbers = #tpu.dot_dimension_numbers<[1], [0], [0], [1], [0, 0, 1, 1], [], []>} : vector<16x128xbf16>, vector<128x128xbf16>, vector<16x128xf32> -> vector<16x128xf32>
    %c0_10 = arith.constant 0 : index
    %c0_11 = arith.constant 0 : index
    %12 = vector.load %arg5[%c0_10, %c0_11] : memref<1x128xf32, #tpu.memory_space<vmem>>, vector<1x128xf32>
    %13 = vector.broadcast %12 : vector<1x128xf32> to vector<16x128xf32>
    %14 = arith.addf %11, %13 : vector<16x128xf32>
    %cst_12 = arith.constant 0.000000e+00 : f32
    %15 = vector.broadcast %cst_12 : f32 to vector<16x128xf32>
    %16 = arith.maximumf %14, %15 : vector<16x128xf32>
    %c1 = arith.constant 1 : index
    %c0_13 = arith.constant 0 : index
    %c0_14 = arith.constant 0 : index
    %17 = vector.load %arg1[%c1, %c0_13, %c0_14] : memref<2x16x128xbf16, #tpu.memory_space<vmem>>, vector<1x16x128xbf16>
    %18 = vector.shape_cast %17 : vector<1x16x128xbf16> to vector<16x128xbf16>
    %c0_15 = arith.constant 0 : index
    %c0_16 = arith.constant 0 : index
    %19 = vector.load %arg6[%c0_15, %c0_16] : memref<128x128xbf16, #tpu.memory_space<vmem>>, vector<128x128xbf16>
    %cst_17 = arith.constant dense<0.000000e+00> : vector<16x128xf32>
    %20 = tpu.matmul %18, %19, %cst_17 {dimension_numbers = #tpu.dot_dimension_numbers<[1], [0], [0], [1], [0, 0, 1, 1], [], []>} : vector<16x128xbf16>, vector<128x128xbf16>, vector<16x128xf32> -> vector<16x128xf32>
    %c0_18 = arith.constant 0 : index
    %c0_19 = arith.constant 0 : index
    %21 = vector.load %arg7[%c0_18, %c0_19] : memref<1x128xf32, #tpu.memory_space<vmem>>, vector<1x128xf32>
    %22 = vector.broadcast %21 : vector<1x128xf32> to vector<16x128xf32>
    %23 = arith.addf %20, %22 : vector<16x128xf32>
    %cst_20 = arith.constant 0.000000e+00 : f32
    %24 = vector.broadcast %cst_20 : f32 to vector<16x128xf32>
    %25 = arith.maximumf %23, %24 : vector<16x128xf32>
    %26 = arith.truncf %25 : vector<16x128xf32> to vector<16x128xbf16>
    %c0_21 = arith.constant 0 : index
    %c0_22 = arith.constant 0 : index
    %27 = vector.load %arg8[%c0_21, %c0_22] : memref<128x128xbf16, #tpu.memory_space<vmem>>, vector<128x128xbf16>
    %cst_23 = arith.constant dense<0.000000e+00> : vector<16x128xf32>
    %28 = tpu.matmul %26, %27, %cst_23 {dimension_numbers = #tpu.dot_dimension_numbers<[1], [0], [0], [1], [0, 0, 1, 1], [], []>} : vector<16x128xbf16>, vector<128x128xbf16>, vector<16x128xf32> -> vector<16x128xf32>
    %c0_24 = arith.constant 0 : index
    %c0_25 = arith.constant 0 : index
    %29 = vector.load %arg9[%c0_24, %c0_25] : memref<1x128xf32, #tpu.memory_space<vmem>>, vector<1x128xf32>
    %30 = vector.broadcast %29 : vector<1x128xf32> to vector<16x128xf32>
    %31 = arith.addf %28, %30 : vector<16x128xf32>
    %cst_26 = arith.constant 0.000000e+00 : f32
    %32 = vector.broadcast %cst_26 : f32 to vector<16x128xf32>
    %33 = arith.maximumf %31, %32 : vector<16x128xf32>
    %34 = arith.addf %16, %33 : vector<16x128xf32>
    %35 = arith.truncf %34 : vector<16x128xf32> to vector<16x128xbf16>
    %c0_27 = arith.constant 0 : index
    %c0_28 = arith.constant 0 : index
    %36 = vector.load %arg10[%c0_27, %c0_28] : memref<128x128xbf16, #tpu.memory_space<vmem>>, vector<128x128xbf16>
    %cst_29 = arith.constant dense<0.000000e+00> : vector<16x128xf32>
    %37 = tpu.matmul %35, %36, %cst_29 {dimension_numbers = #tpu.dot_dimension_numbers<[1], [0], [0], [1], [0, 0, 1, 1], [], []>} : vector<16x128xbf16>, vector<128x128xbf16>, vector<16x128xf32> -> vector<16x128xf32>
    %c0_30 = arith.constant 0 : index
    %c0_31 = arith.constant 0 : index
    %38 = vector.load %arg11[%c0_30, %c0_31] : memref<1x128xf32, #tpu.memory_space<vmem>>, vector<1x128xf32>
    %39 = vector.broadcast %38 : vector<1x128xf32> to vector<16x128xf32>
    %40 = arith.addf %37, %39 : vector<16x128xf32>
    %cst_32 = arith.constant 0.000000e+00 : f32
    %41 = vector.broadcast %cst_32 : f32 to vector<16x128xf32>
    %42 = arith.maximumf %40, %41 : vector<16x128xf32>
    %43 = arith.truncf %42 : vector<16x128xf32> to vector<16x128xbf16>
    %c0_33 = arith.constant 0 : index
    %c0_34 = arith.constant 0 : index
    %44 = vector.load %arg12[%c0_33, %c0_34] : memref<128x128xbf16, #tpu.memory_space<vmem>>, vector<128x128xbf16>
    %cst_35 = arith.constant dense<0.000000e+00> : vector<16x128xf32>
    %45 = tpu.matmul %43, %44, %cst_35 {dimension_numbers = #tpu.dot_dimension_numbers<[1], [0], [0], [1], [0, 0, 1, 1], [], []>} : vector<16x128xbf16>, vector<128x128xbf16>, vector<16x128xf32> -> vector<16x128xf32>
    %c0_36 = arith.constant 0 : index
    %c0_37 = arith.constant 0 : index
    %46 = vector.load %arg13[%c0_36, %c0_37] : memref<1x128xf32, #tpu.memory_space<vmem>>, vector<1x128xf32>
    %47 = vector.broadcast %46 : vector<1x128xf32> to vector<16x128xf32>
    %48 = arith.addf %45, %47 : vector<16x128xf32>
    %49 = arith.truncf %48 : vector<16x128xf32> to vector<16x128xbf16>
    %c0_38 = arith.constant 0 : index
    %c0_39 = arith.constant 0 : index
    %50 = vector.load %arg14[%c0_38, %c0_39] : memref<16x128xbf16, #tpu.memory_space<vmem>>, vector<16x128xbf16>
    tpu.vector_store %arg14[%c0_38, %c0_39], %49 {strides = array<i32>} : memref<16x128xbf16, #tpu.memory_space<vmem>>, vector<16x128xbf16>,
    return
  }
  func.func @transform_0(%arg0: i32) -> (i32, i32, i32) {
    %c0_i32 = arith.constant 0 : i32
    %c0_i32_0 = arith.constant 0 : i32
    %c0_i32_1 = arith.constant 0 : i32
    return %c0_i32, %arg0, %c0_i32_0 : i32, i32, i32
  }
  func.func @transform_1(%arg0: i32) -> (i32, i32) {
    %c0_i32 = arith.constant 0 : i32
    %c0_i32_0 = arith.constant 0 : i32
    %c0_i32_1 = arith.constant 0 : i32
    return %c0_i32, %c0_i32_0 : i32, i32
  }
  func.func @transform_2(%arg0: i32) -> (i32, i32) {
    %c0_i32 = arith.constant 0 : i32
    %c0_i32_0 = arith.constant 0 : i32
    %c0_i32_1 = arith.constant 0 : i32
    return %c0_i32, %c0_i32_0 : i32, i32
  }
  func.func @transform_3(%arg0: i32) -> (i32, i32) {
    %c0_i32 = arith.constant 0 : i32
    %c0_i32_0 = arith.constant 0 : i32
    %c0_i32_1 = arith.constant 0 : i32
    return %c0_i32, %c0_i32_0 : i32, i32
  }
  func.func @transform_4(%arg0: i32) -> (i32, i32) {
    %c0_i32 = arith.constant 0 : i32
    %c0_i32_0 = arith.constant 0 : i32
    %c0_i32_1 = arith.constant 0 : i32
    return %c0_i32, %c0_i32_0 : i32, i32
  }
  func.func @transform_5(%arg0: i32) -> (i32, i32) {
    %c0_i32 = arith.constant 0 : i32
    %c0_i32_0 = arith.constant 0 : i32
    %c0_i32_1 = arith.constant 0 : i32
    return %c0_i32, %c0_i32_0 : i32, i32
  }
  func.func @transform_6(%arg0: i32) -> (i32, i32) {
    %c0_i32 = arith.constant 0 : i32
    %c0_i32_0 = arith.constant 0 : i32
    %c0_i32_1 = arith.constant 0 : i32
    return %c0_i32, %c0_i32_0 : i32, i32
  }
  func.func @transform_7(%arg0: i32) -> (i32, i32) {
    %c0_i32 = arith.constant 0 : i32
    %c0_i32_0 = arith.constant 0 : i32
    %c0_i32_1 = arith.constant 0 : i32
    return %c0_i32, %c0_i32_0 : i32, i32
  }
  func.func @transform_8(%arg0: i32) -> (i32, i32) {
    %c0_i32 = arith.constant 0 : i32
    %c0_i32_0 = arith.constant 0 : i32
    %c0_i32_1 = arith.constant 0 : i32
    return %c0_i32, %c0_i32_0 : i32, i32
  }
  func.func @transform_9(%arg0: i32) -> (i32, i32) {
    %c0_i32 = arith.constant 0 : i32
    %c0_i32_0 = arith.constant 0 : i32
    %c0_i32_1 = arith.constant 0 : i32
    return %c0_i32, %c0_i32_0 : i32, i32
  }
  func.func @transform_10(%arg0: i32) -> (i32, i32) {
    %c0_i32 = arith.constant 0 : i32
    %c0_i32_0 = arith.constant 0 : i32
    %c0_i32_1 = arith.constant 0 : i32
    return %c0_i32, %c0_i32_0 : i32, i32
  }
  func.func @transform_11(%arg0: i32) -> (i32, i32) {
    %c0_i32 = arith.constant 0 : i32
    %c0_i32_0 = arith.constant 0 : i32
    %c0_i32_1 = arith.constant 0 : i32
    return %c0_i32, %c0_i32_0 : i32, i32
  }
  func.func @transform_12(%arg0: i32) -> (i32, i32) {
    %c0_i32 = arith.constant 0 : i32
    %c0_i32_0 = arith.constant 0 : i32
    %c0_i32_1 = arith.constant 0 : i32
    return %c0_i32, %c0_i32_0 : i32, i32
  }
  func.func @transform_13(%arg0: i32) -> (i32, i32) {
    %c0_i32 = arith.constant 0 : i32
    %c0_i32_0 = arith.constant 0 : i32
    return %arg0, %c0_i32 : i32, i32
  }
}

</mosaic_0001>

<bundles_post_ra>
// kernel: tpu_custom_call.1
= control target key start
LH: loop header
LB: loop body
LE: loop exit
PB: predicated region body
PF: predicated region fallthrough
CT: control target
= control target key end

     0   :  { %18 = vsyncpa [#allocation3], 0  ;;  %s1664_s0 = inlined_call_operand.hbm [shape: bf16[2,16,128], index: 0, kind: input, shape index: {}]   ;;  %s1665_s1 = inlined_call_operand.hbm [shape: bf16[128,128], index: 1, kind: input, shape index: {}]   ;;  %s1666_s2 = inlined_call_operand.vmem [shape: f32[1,128], index: 2, kind: input, shape index: {}]   ;;  %s1667_s3 = inlined_call_operand.hbm [shape: bf16[128,128], index: 3, kind: input, shape index: {}]   ;;  %s1668_s4 = inlined_call_operand.vmem [shape: f32[1,128], index: 4, kind: input, shape index: {}]   ;;  %s1669_s5 = inlined_call_operand.hbm [shape: bf16[128,128], index: 5, kind: input, shape index: {}]   ;;  %s1670_s6 = inlined_call_operand.vmem [shape: f32[1,128], index: 6, kind: input, shape index: {}]   ;;  %s1671_s7 = inlined_call_operand.hbm [shape: bf16[128,128], index: 7, kind: input, shape index: {}]   ;;  %s1672_s8 = inlined_call_operand.vmem [shape: f32[1,128], index: 8, kind: input, shape index: {}]   ;;  %s1673_s9 = inlined_call_operand.hbm [shape: bf16[128,128], index: 9, kind: input, shape index: {}]   ;;  %s1674_s10 = inlined_call_operand.vmem [shape: f32[1,128], index: 10, kind: input, shape index: {}]   ;;  %s1675_s11 = inlined_call_operand.hbm [shape: bf16[128,128], index: 11, kind: input, shape index: {}]   ;;  %s1676_s12 = inlined_call_operand.vmem [shape: f32[1,128], index: 12, kind: input, shape index: {}]   ;;  %s1677_s13 = inlined_call_operand.hbm [shape: bf16[16,128], index: 13, kind: output, shape index: {}]  }
   0x1   :  { %19 = vsyncpa [#allocation6], 0 }
   0x2   :  { %20 = vsyncpa [#allocation9], 0 }
   0x3   :  { %21 = vsyncpa [#allocation12], 0 }
   0x4   :  { %22 = vsyncpa [#allocation4], 0  ;;  %s1363_s25 = smov [#allocation5]   ;;  %s1364_s27 = smov [#allocation8]  }
   0x5   :  { %s40_s26 = sshll.u32 %s1363_s25, 4  ;;  %s68_s28 = sshll.u32 %s1364_s27, 4  ;;  %s41_s26 = int_to_ptr.vmem [resolvable:$true] %s40_s26  ;;  %s1445_s28 = int_to_ptr.vmem [resolvable:$true] %s68_s28 }
   0x6   :  { %s1177_s14 = scalar_lea.hbm %s1665_s1, 1024 }
   0x7   :  { %p1178_p0 = scmp.ne.s32.totalorder %s1665_s1, %s1177_s14  ;;  %p1181_p1 = scmp.lt.u32.totalorder %s1177_s14, %s1665_s1 }
   0x9   :  { %p1183_p2 = pnand %p1181_p1, %p1178_p0 }
   0xb   :  { %1186 = shalt.err (!%p1183_p2)
}
   0xc   :  { %s1187_s19 = scalar_lea.vmem %s41_s26, 1024  ;;  %p1192_p4 = scmp.lt.s32.totalorder %s41_s26, %s41_s26 }
   0xd   :  { %p1188_p3 = scmp.ne.s32.totalorder %s41_s26, %s1187_s19  ;;  %p1193_p5 = scmp.lt.s32.totalorder %s1187_s19, %s1187_s19 }
   0xf   :  { %p1194_p6 = por %p1193_p5, %p1192_p4 }
  0x11   :  { %p1195_p7 = pnand %p1194_p6, %p1188_p3 }
  0x13   :  { %1198 = shalt.err (!%p1195_p7)
}
  0x14   :  { %s1365_s20 = smov 64   ;;  %s1366_s21 = smov 4  }
  0x15   :  { %46 = dma.hbm_to_vmem [thread:$0]  %s1665_s1, 1024, %s41_s26, [#allocation6], %s1365_s20, %s1365_s20, %s1366_s21  }
  0x16   :  { %s1199_s27 = scalar_lea.hbm %s1669_s5, 1024 }
  0x17   :  { %p1200_p8 = scmp.ne.s32.totalorder %s1669_s5, %s1199_s27  ;;  %p1203_p9 = scmp.lt.u32.totalorder %s1199_s27, %s1669_s5 }
  0x19   :  { %p1205_p10 = pnand %p1203_p9, %p1200_p8 }
  0x1b   :  { %1208 = shalt.err (!%p1205_p10)
}
  0x1c   :  { %s1209_s16 = scalar_lea.vmem %s1445_s28, 1024  ;;  %p1214_p12 = scmp.lt.s32.totalorder %s1445_s28, %s1445_s28 }
  0x1d   :  { %p1210_p11 = scmp.ne.s32.totalorder %s1445_s28, %s1209_s16  ;;  %p1215_p13 = scmp.lt.s32.totalorder %s1209_s16, %s1209_s16 }
  0x1f   :  { %p1216_p0 = por %p1215_p13, %p1214_p12 }
  0x21   :  { %p1217_p1 = pnand %p1216_p0, %p1210_p11 }
  0x23   :  { %1220 = shalt.err (!%p1217_p1)
}
  0x24   :  { %74 = dma.hbm_to_vmem [thread:$0]  %s1669_s5, 1024, %s1445_s28, [#allocation9], %s1365_s20, %s1365_s20, %s1366_s21  }
  0x25   :  { %s1367_s17 = smov [#allocation11]   ;;  %s1368_s19 = smov [#allocation2]  }
  0x26   :  { %s96_s18 = sshll.u32 %s1367_s17, 4  ;;  %s28_s22 = sshll.u32 %s1368_s19, 4  ;;  %s97_s18 = int_to_ptr.vmem [resolvable:$true] %s96_s18  ;;  %s1482_s22 = int_to_ptr.vmem [resolvable:$true] %s28_s22 }
  0x27   :  { %s1221_s25 = scalar_lea.hbm %s1673_s9, 1024 }
  0x28   :  { %p1222_p2 = scmp.ne.s32.totalorder %s1673_s9, %s1221_s25  ;;  %p1225_p3 = scmp.lt.u32.totalorder %s1221_s25, %s1673_s9 }
  0x2a   :  { %p1227_p4 = pnand %p1225_p3, %p1222_p2 }
  0x2c   :  { %1230 = shalt.err (!%p1227_p4)
}
  0x2d   :  { %s1231_s5 = scalar_lea.vmem %s97_s18, 1024  ;;  %p1236_p6 = scmp.lt.s32.totalorder %s97_s18, %s97_s18 }
  0x2e   :  { %p1232_p5 = scmp.ne.s32.totalorder %s97_s18, %s1231_s5  ;;  %p1237_p7 = scmp.lt.s32.totalorder %s1231_s5, %s1231_s5 }
  0x30   :  { %p1238_p8 = por %p1237_p7, %p1236_p6 }
  0x32   :  { %p1239_p9 = pnand %p1238_p8, %p1232_p5 }
  0x34   :  { %1242 = shalt.err (!%p1239_p9)
}
  0x35   :  { %102 = dma.hbm_to_vmem [thread:$0]  %s1673_s9, 1024, %s97_s18, [#allocation12], %s1365_s20, %s1365_s20, %s1366_s21  }
  0x36   :  { %s1243_s26 = scalar_lea.hbm %s1664_s0, 256 }
  0x37   :  { %p1244_p10 = scmp.ne.s32.totalorder %s1664_s0, %s1243_s26  ;;  %p1247_p11 = scmp.lt.u32.totalorder %s1243_s26, %s1664_s0 }
  0x39   :  { %p1249_p12 = pnand %p1247_p11, %p1244_p10 }
  0x3b   :  { %1252 = shalt.err (!%p1249_p12)
}
  0x3c   :  { %s1253_s25 = scalar_lea.vmem %s1482_s22, 256  ;;  %p1258_p0 = scmp.lt.s32.totalorder %s1482_s22, %s1482_s22 }
  0x3d   :  { %p1254_p13 = scmp.ne.s32.totalorder %s1482_s22, %s1253_s25  ;;  %p1259_p1 = scmp.lt.s32.totalorder %s1253_s25, %s1253_s25 }
  0x3f   :  { %p1260_p2 = por %p1259_p1, %p1258_p0 }
  0x41   :  { %p1261_p3 = pnand %p1260_p2, %p1254_p13 }
  0x43   :  { %1264 = shalt.err (!%p1261_p3)
}
  0x44   :  { %34 = dma.hbm_to_vmem [thread:$0]  %s1664_s0, 256, %s1482_s22, [#allocation3], %s1365_s20, %s1365_s20, %s1366_s21  }
  0x45   :  { %s1369_s27 = smov [#allocation7]   ;;  %s1370_s30 = smov [#allocation10]  }
  0x46   :  { %s54_s29 = sshll.u32 %s1369_s27, 4  ;;  %s82_s14 = sshll.u32 %s1370_s30, 4  ;;  %s55_s29 = int_to_ptr.vmem [resolvable:$true] %s54_s29  ;;  %s1519_s14 = int_to_ptr.vmem [resolvable:$true] %s82_s14 }
  0x47   :  { %s1265_s15 = scalar_lea.hbm %s1667_s3, 1024 }
  0x48   :  { %p1266_p4 = scmp.ne.s32.totalorder %s1667_s3, %s1265_s15  ;;  %p1269_p5 = scmp.lt.u32.totalorder %s1265_s15, %s1667_s3 }
  0x4a   :  { %p1271_p6 = pnand %p1269_p5, %p1266_p4 }
  0x4c   :  { %1274 = shalt.err (!%p1271_p6)
}
  0x4d   :  { %s1275_s0 = scalar_lea.vmem %s55_s29, 1024  ;;  %p1280_p8 = scmp.lt.s32.totalorder %s55_s29, %s55_s29 }
  0x4e   :  { %p1276_p7 = scmp.ne.s32.totalorder %s55_s29, %s1275_s0  ;;  %p1281_p9 = scmp.lt.s32.totalorder %s1275_s0, %s1275_s0 }
  0x50   :  { %p1282_p10 = por %p1281_p9, %p1280_p8 }
  0x52   :  { %p1283_p11 = pnand %p1282_p10, %p1276_p7 }
  0x54   :  { %1286 = shalt.err (!%p1283_p11)
}
  0x55   :  { %60 = dma.hbm_to_vmem [thread:$0]  %s1667_s3, 1024, %s55_s29, [#allocation6], %s1365_s20, %s1365_s20, %s1366_s21  }
  0x56   :  { %s1287_s25 = scalar_lea.hbm %s1671_s7, 1024 }
  0x57   :  { %p1288_p12 = scmp.ne.s32.totalorder %s1671_s7, %s1287_s25  ;;  %p1291_p13 = scmp.lt.u32.totalorder %s1287_s25, %s1671_s7 }
  0x59   :  { %p1293_p0 = pnand %p1291_p13, %p1288_p12 }
  0x5b   :  { %1296 = shalt.err (!%p1293_p0)
}
  0x5c   :  { %s1297_s5 = scalar_lea.vmem %s1519_s14, 1024  ;;  %p1302_p2 = scmp.lt.s32.totalorder %s1519_s14, %s1519_s14 }
  0x5d   :  { %p1298_p1 = scmp.ne.s32.totalorder %s1519_s14, %s1297_s5  ;;  %p1303_p3 = scmp.lt.s32.totalorder %s1297_s5, %s1297_s5 }
  0x5f   :  { %p1304_p4 = por %p1303_p3, %p1302_p2 }
  0x61   :  { %p1305_p5 = pnand %p1304_p4, %p1298_p1 }
  0x63   :  { %1308 = shalt.err (!%p1305_p5)
}
  0x64   :  { %88 = dma.hbm_to_vmem [thread:$0]  %s1671_s7, 1024, %s1519_s14, [#allocation9], %s1365_s20, %s1365_s20, %s1366_s21  }
  0x65   :  { %s1371_s28 = smov [#allocation13]   ;;  %s1309_s26 = scalar_lea.hbm %s1675_s11, 1024 }
  0x66   :  { %s110_s15 = sshll.u32 %s1371_s28, 4  ;;  %p1310_p6 = scmp.ne.s32.totalorder %s1675_s11, %s1309_s26  ;;  %s111_s15 = int_to_ptr.vmem [resolvable:$true] %s110_s15 }
  0x67   :  { %p1313_p7 = scmp.lt.u32.totalorder %s1309_s26, %s1675_s11 }
  0x69   :  { %p1315_p8 = pnand %p1313_p7, %p1310_p6 }
  0x6b   :  { %1318 = shalt.err (!%p1315_p8)
}
  0x6c   :  { %s1319_s23 = scalar_lea.vmem %s111_s15, 1024  ;;  %p1324_p10 = scmp.lt.s32.totalorder %s111_s15, %s111_s15 }
  0x6d   :  { %p1320_p9 = scmp.ne.s32.totalorder %s111_s15, %s1319_s23  ;;  %p1325_p11 = scmp.lt.s32.totalorder %s1319_s23, %s1319_s23 }
  0x6f   :  { %p1326_p12 = por %p1325_p11, %p1324_p10 }
  0x71   :  { %p1327_p13 = pnand %p1326_p12, %p1320_p9 }
  0x73   :  { %1330 = shalt.err (!%p1327_p13)
}
  0x74   :  { %116 = dma.hbm_to_vmem [thread:$0]  %s1675_s11, 1024, %s111_s15, [#allocation12], %s1365_s20, %s1365_s20, %s1366_s21  }
  0x75   :  { %1353 = dma.done.wait [#allocation3], 256  }
  0x76   :  { %1354 = vsyncadd [#allocation3], 4294967040 }
  0x77   :  { %1355 = dma.done.wait [#allocation6], 2048  }
  0x78   :  { %1356 = vsyncadd [#allocation6], 4294965248 }
  0x79   :  { %1357 = dma.done.wait [#allocation9], 2048  }
  0x7a   :  { %1358 = vsyncadd [#allocation9], 4294965248 }
  0x7b   :  { %1359 = dma.done.wait [#allocation12], 2048  }
  0x7c   :  { %1360 = vsyncadd [#allocation12], 4294965248  ;;  %v1372_v0 = vmov 0.0   ;;  %vm1373_vm0 = vmmov 0   ;;  %v1127_v1 = vld [vmem:[#allocation5] sm:$0xff]   ;;  %v1128_v2 = vld [vmem:[#allocation5 + $0x8] sm:$0xff]  }
  0x7d   :  { %995 = vmatprep.subr.bf16.mxu0 %v1372_v0  ;;  %1011 = vmatprep.mubr.msk.bf16.mxu0 %vm1373_vm0, %v1372_v0  ;;  %v1129_v3 = vld [vmem:[#allocation5 + $0x10] sm:$0xff]   ;;  %v1130_v4 = vld [vmem:[#allocation5 + $0x18] sm:$0xff]   ;;  %v1131_v5 = vld [vmem:[#allocation5 + $0x20] sm:$0xff]   ;;  %s1374_s3 = smov [#allocation14]  }
  0x7e   :  { %1015 = vmatprep.subr.bf16.mxu1 %v1372_v0  ;;  %1031 = vmatprep.mubr.msk.bf16.mxu1 %vm1373_vm0, %v1372_v0  ;;  %v1132_v6 = vld [vmem:[#allocation5 + $0x28] sm:$0xff]   ;;  %v1145_v7 = vld [vmem:[#allocation7] sm:$0xff]   ;;  %v1133_v9 = vld [vmem:[#allocation5 + $0x30] sm:$0xff]   ;;  %s861_s29 = sshll.u32 %s1374_s3, 4  ;;  %s862_s29 = int_to_ptr.vmem [resolvable:$true] %s861_s29 }
  0x7f   :  { %996 = vmatpush3.bf16.msra.mxu0 %v1127_v1  ;;  %1016 = vmatpush3.bf16.msra.mxu1 %v1145_v7  ;;  %v1146_v8 = vld [vmem:[#allocation7 + $0x8] sm:$0xff]   ;;  %v1134_v10 = vld [vmem:[#allocation5 + $0x38] sm:$0xff]   ;;  %v1147_v11 = vld [vmem:[#allocation7 + $0x10] sm:$0xff]   ;;  %p1336_p1 = scmp.lt.s32.totalorder %s862_s29, %s862_s29 }
  0x80   :  { %997 = vmatprep.subr.bf16.mxu0 %v1372_v0  ;;  %1017 = vmatprep.subr.bf16.mxu1 %v1372_v0  ;;  %v1148_v12 = vld [vmem:[#allocation7 + $0x18] sm:$0xff]   ;;  %v1135_v13 = vld [vmem:[#allocation2] sm:$0xff]   ;;  %v1136_v14 = vld [vmem:[#allocation8] sm:$0xff]  }
  0x81   :  { %v1149_v15 = vld [vmem:[#allocation7 + $0x20] sm:$0xff]   ;;  %v1137_v16 = vld [vmem:[#allocation8 + $0x8] sm:$0xff]   ;;  %v1138_v18 = vld [vmem:[#allocation8 + $0x10] sm:$0xff]  }
  0x82   :  { %v1150_v17 = vld [vmem:[#allocation7 + $0x28] sm:$0xff]   ;;  %v1139_v19 = vld [vmem:[#allocation8 + $0x18] sm:$0xff]   ;;  %v1140_v20 = vld [vmem:[#allocation8 + $0x20] sm:$0xff]  }
  0x83   :  { %998 = vmatpush3.bf16.msra.mxu0 %v1128_v2  ;;  %1018 = vmatpush3.bf16.msra.mxu1 %v1146_v8  ;;  %v1141_v21 = vld [vmem:[#allocation8 + $0x28] sm:$0xff]   ;;  %v1142_v22 = vld [vmem:[#allocation8 + $0x30] sm:$0xff]   ;;  %v1143_v23 = vld [vmem:[#allocation8 + $0x38] sm:$0xff]  }
  0x84   :  { %999 = vmatprep.subr.bf16.mxu0 %v1372_v0  ;;  %1019 = vmatprep.subr.bf16.mxu1 %v1372_v0  ;;  %v1144_v24 = vld [vmem:[#allocation2 + $0x8] sm:$0xff]   ;;  %v1151_v25 = vld [vmem:[#allocation7 + $0x30] sm:$0xff]   ;;  %v1153_v36 = vld [vmem:[#allocation10] sm:$0xff]  }
  0x85   :  { %v1152_v26 = vld [vmem:[#allocation7 + $0x38] sm:$0xff]   ;;  %v876_v27 = vld [vmem:[%s1666_s2] ss:$0 sm:$0xff]  ;;  %v1154_v38 = vld [vmem:[#allocation10 + $0x8] sm:$0xff]  }
  0x86   :  { %v1155_v39 = vld [vmem:[#allocation10 + $0x10] sm:$0xff]   ;;  %v1156_v40 = vld [vmem:[#allocation10 + $0x18] sm:$0xff]   ;;  %v1157_v41 = vld [vmem:[#allocation10 + $0x20] sm:$0xff]  }
  0x87   :  { %1000 = vmatpush3.bf16.msra.mxu0 %v1129_v3  ;;  %1020 = vmatpush3.bf16.msra.mxu1 %v1147_v11  ;;  %v1158_v42 = vld [vmem:[#allocation10 + $0x28] sm:$0xff]   ;;  %v895_v43 = vld [vmem:[%s1670_s6] ss:$0 sm:$0xff]  ;;  %v1160_v49 = vld [vmem:[#allocation10 + $0x38] sm:$0xff]  }
  0x88   :  { %1001 = vmatprep.subr.bf16.mxu0 %v1372_v0  ;;  %1021 = vmatprep.subr.bf16.mxu1 %v1372_v0  ;;  %v1159_v44 = vld [vmem:[#allocation10 + $0x30] sm:$0xff]   ;;  %v1161_v55 = vld [vmem:[#allocation11] sm:$0xff]   ;;  %v1162_v56 = vld [vmem:[#allocation11 + $0x8] sm:$0xff]  }
  0x89   :  { %v1163_v57 = vld [vmem:[#allocation11 + $0x10] sm:$0xff]   ;;  %v1164_v58 = vld [vmem:[#allocation11 + $0x18] sm:$0xff]   ;;  %v1165_v59 = vld [vmem:[#allocation11 + $0x20] sm:$0xff]  }
  0x8a   :  { %v1166_v60 = vld [vmem:[#allocation11 + $0x28] sm:$0xff]   ;;  %v1167_v61 = vld [vmem:[#allocation11 + $0x30] sm:$0xff]   ;;  %v1168_v62 = vld [vmem:[#allocation11 + $0x38] sm:$0xff]  }
  0x8b   :  { %1002 = vmatpush3.bf16.msra.mxu0 %v1130_v4  ;;  %1022 = vmatpush3.bf16.msra.mxu1 %v1148_v12  ;;  %v1169_v63 = vld [vmem:[#allocation13] sm:$0xff]   ;;  %v1170_v1 = vld [vmem:[#allocation13 + $0x8] sm:$0xff]   ;;  %v1171_v2 = vld [vmem:[#allocation13 + $0x10] sm:$0xff]  }
  0x8c   :  { %1003 = vmatprep.subr.bf16.mxu0 %v1372_v0  ;;  %1023 = vmatprep.subr.bf16.mxu1 %v1372_v0  ;;  %v1172_v3 = vld [vmem:[#allocation13 + $0x18] sm:$0xff]   ;;  %v1173_v4 = vld [vmem:[#allocation13 + $0x20] sm:$0xff]   ;;  %v905_v11 = vld [vmem:[%s1672_s8] ss:$0 sm:$0xff] }
  0x8f   :  { %1004 = vmatpush3.bf16.msra.mxu0 %v1131_v5  ;;  %1024 = vmatpush3.bf16.msra.mxu1 %v1149_v15  ;;  %v1174_v5 = vld [vmem:[#allocation13 + $0x28] sm:$0xff]  }
  0x90   :  { %1005 = vmatprep.subr.bf16.mxu0 %v1372_v0  ;;  %1025 = vmatprep.subr.bf16.mxu1 %v1372_v0 }
  0x93   :  { %1006 = vmatpush3.bf16.msra.mxu0 %v1132_v6  ;;  %1026 = vmatpush3.bf16.msra.mxu1 %v1150_v17 }
  0x94   :  { %1007 = vmatprep.subr.bf16.mxu0 %v1372_v0  ;;  %1027 = vmatprep.subr.bf16.mxu1 %v1372_v0 }
  0x97   :  { %1008 = vmatpush3.bf16.msra.mxu0 %v1133_v9  ;;  %1028 = vmatpush3.bf16.msra.mxu1 %v1151_v25 }
  0x98   :  { %1009 = vmatprep.subr.bf16.mxu0 %v1372_v0  ;;  %1029 = vmatprep.subr.bf16.mxu1 %v1372_v0 }
  0x9b   :  { %1010 = vmatpush3.bf16.msra.mxu0 %v1134_v10  ;;  %1030 = vmatpush3.bf16.msra.mxu1 %v1152_v26  ;;  %v886_v10 = vld [vmem:[%s1668_s4] ss:$0 sm:$0xff] }
  0x9c   :  { %1035 = vmatprep.subr.bf16.mxu0 %v1372_v0  ;;  %1055 = vmatprep.subr.bf16.mxu1 %v1372_v0 }
  0x9e   :  { %1012 = vmatmul.mubr.bf16.vlgmr.msra.gmra.mrb[0].mxu0 %v1135_v13 }
  0x9f   :  { %1036 = vmatpush3.bf16.msra.mxu0 %v1136_v14  ;;  %1051 = vmatprep.mubr.msk.bf16.mxu0 %vm1373_vm0, %v1372_v0 }
  0xa0   :  { %1037 = vmatprep.subr.bf16.mxu0 %v1372_v0 }
  0xa3   :  { %1038 = vmatpush3.bf16.msra.mxu0 %v1137_v16 }
  0xa4   :  { %1039 = vmatprep.subr.bf16.mxu0 %v1372_v0 }
  0xa7   :  { %1040 = vmatpush3.bf16.msra.mxu0 %v1138_v18 }
  0xa8   :  { %1041 = vmatprep.subr.bf16.mxu0 %v1372_v0 }
  0xab   :  { %1042 = vmatpush3.bf16.msra.mxu0 %v1139_v19 }
  0xac   :  { %1043 = vmatprep.subr.bf16.mxu0 %v1372_v0 }
  0xaf   :  { %1044 = vmatpush3.bf16.msra.mxu0 %v1140_v20 }
  0xb0   :  { %1045 = vmatprep.subr.bf16.mxu0 %v1372_v0 }
  0xb3   :  { %1046 = vmatpush3.bf16.msra.mxu0 %v1141_v21 }
  0xb4   :  { %1047 = vmatprep.subr.bf16.mxu0 %v1372_v0 }
  0xb7   :  { %1048 = vmatpush3.bf16.msra.mxu0 %v1142_v22 }
  0xb8   :  { %1049 = vmatprep.subr.bf16.mxu0 %v1372_v0 }
  0xbb   :  { %1050 = vmatpush3.bf16.msra.mxu0 %v1143_v23 }
  0xbc   :  { %1075 = vmatprep.subr.bf16.mxu0 %v1372_v0 }
  0xbe   :  { %1052 = vmatmul.mubr.bf16.vlgmr.msra.gmra.mrb[4].mxu0 %v1144_v24 }
  0xbf   :  { %1091 = vmatprep.mubr.msk.bf16.mxu0 %vm1373_vm0, %v1372_v0  ;;  %1076 = vmatpush3.bf16.msra.mxu0 %v1161_v55 }
  0xc0   :  { %1077 = vmatprep.subr.bf16.mxu0 %v1372_v0 }
  0xc3   :  { %1078 = vmatpush3.bf16.msra.mxu0 %v1162_v56 }
  0xc4   :  { %1079 = vmatprep.subr.bf16.mxu0 %v1372_v0 }
  0xc7   :  { %1080 = vmatpush3.bf16.msra.mxu0 %v1163_v57 }
  0xc8   :  { %1081 = vmatprep.subr.bf16.mxu0 %v1372_v0 }
  0xcb   :  { %1082 = vmatpush3.bf16.msra.mxu0 %v1164_v58 }
  0xcc   :  { %1083 = vmatprep.subr.bf16.mxu0 %v1372_v0 }
  0xcf   :  { %1084 = vmatpush3.bf16.msra.mxu0 %v1165_v59 }
  0xd0   :  { %1085 = vmatprep.subr.bf16.mxu0 %v1372_v0 }
  0xd3   :  { %1086 = vmatpush3.bf16.msra.mxu0 %v1166_v60 }
  0xd4   :  { %1087 = vmatprep.subr.bf16.mxu0 %v1372_v0 }
  0xd7   :  { %1088 = vmatpush3.bf16.msra.mxu0 %v1167_v61 }
  0xd8   :  { %1089 = vmatprep.subr.bf16.mxu0 %v1372_v0 }
  0xdb   :  { %1090 = vmatpush3.bf16.msra.mxu0 %v1168_v62 }
 0x171   :  { %v254_v28 = vpop.f32.mrb[0].mxu0 }
 0x172   :  { %v255_v29 = vadd.f32 %v876_v27, %v254_v28  ;;  %v1013_v30 = vpop.f32.mrb[1].mxu0  ;;  %v1176_v28 = vld [vmem:[#allocation13 + $0x38] sm:$0xff]  }
 0x173   :  { %v257_v31 = vpop.f32.mrb[2].mxu0 }
 0x174   :  { %v261_v32 = vmax.f32 %v255_v29, 0.0  ;;  %v258_v33 = vadd.f32 %v876_v27, %v257_v31  ;;  %v1014_v34 = vpop.f32.mrb[3].mxu0  ;;  %v1175_v27 = vld [vmem:[#allocation13 + $0x30] sm:$0xff]  }
 0x175   :  { %v914_v29 = vld [vmem:[%s1674_s10] ss:$0 sm:$0xff]  ;;  %s1331_s10 = scalar_lea.vmem %s862_s29, 128 }
 0x176   :  { %v262_v35 = vmax.f32 %v258_v33, 0.0  ;;  %p1332_p0 = scmp.ne.s32.totalorder %s862_s29, %s1331_s10  ;;  %p1337_p2 = scmp.lt.s32.totalorder %s1331_s10, %s1331_s10 }
 0x178   :  { %v263_v37 = vpack.c.bf16 %v262_v35, %v261_v32  ;;  %p1338_p3 = por %p1337_p2, %p1336_p1 }
 0x17a   :  { %1032 = vmatmul.mubr.bf16.vlgmr.msra.gmra.mrb[0].mxu1 %v263_v37  ;;  %p1339_p4 = pnand %p1338_p3, %p1332_p0 }
 0x17b   :  { %1056 = vmatpush3.bf16.msra.mxu1 %v1153_v36  ;;  %1071 = vmatprep.mubr.msk.bf16.mxu1 %vm1373_vm0, %v1372_v0 }
 0x17c   :  { %1057 = vmatprep.subr.bf16.mxu1 %v1372_v0 }
 0x17f   :  { %1058 = vmatpush3.bf16.msra.mxu1 %v1154_v38 }
 0x180   :  { %1059 = vmatprep.subr.bf16.mxu1 %v1372_v0 }
 0x183   :  { %1060 = vmatpush3.bf16.msra.mxu1 %v1155_v39 }
 0x184   :  { %1061 = vmatprep.subr.bf16.mxu1 %v1372_v0 }
 0x187   :  { %1062 = vmatpush3.bf16.msra.mxu1 %v1156_v40 }
 0x188   :  { %1063 = vmatprep.subr.bf16.mxu1 %v1372_v0 }
 0x18b   :  { %1064 = vmatpush3.bf16.msra.mxu1 %v1157_v41 }
 0x18c   :  { %1065 = vmatprep.subr.bf16.mxu1 %v1372_v0 }
 0x18f   :  { %1066 = vmatpush3.bf16.msra.mxu1 %v1158_v42 }
 0x190   :  { %1067 = vmatprep.subr.bf16.mxu1 %v1372_v0 }
 0x191   :  { %v492_v45 = vpop.f32.mrb[4].mxu0 }
 0x192   :  { %v493_v46 = vadd.f32 %v895_v43, %v492_v45  ;;  %v1053_v47 = vpop.f32.mrb[5].mxu0 }
 0x193   :  { %v495_v48 = vpop.f32.mrb[6].mxu0  ;;  %1068 = vmatpush3.bf16.msra.mxu1 %v1159_v44 }
 0x194   :  { %v496_v50 = vadd.f32 %v895_v43, %v495_v48  ;;  %v1054_v51 = vpop.f32.mrb[7].mxu0  ;;  %1069 = vmatprep.subr.bf16.mxu1 %v1372_v0  ;;  %v499_v52 = vmax.f32 %v493_v46, 0.0 }
 0x196   :  { %v500_v53 = vmax.f32 %v496_v50, 0.0 }
 0x197   :  { %1070 = vmatpush3.bf16.msra.mxu1 %v1160_v49 }
 0x198   :  { %v501_v54 = vpack.c.bf16 %v500_v53, %v499_v52  ;;  %1095 = vmatprep.subr.bf16.mxu1 %v1372_v0 }
 0x19a   :  { %1072 = vmatmul.mubr.bf16.vlgmr.msra.gmra.mrb[4].mxu1 %v501_v54 }
 0x19b   :  { %1111 = vmatprep.mubr.msk.bf16.mxu1 %vm1373_vm0, %v1372_v0  ;;  %1096 = vmatpush3.bf16.msra.mxu1 %v1169_v63 }
 0x19c   :  { %1097 = vmatprep.subr.bf16.mxu1 %v1372_v0 }
 0x19f   :  { %1098 = vmatpush3.bf16.msra.mxu1 %v1170_v1 }
 0x1a0   :  { %1099 = vmatprep.subr.bf16.mxu1 %v1372_v0 }
 0x1a3   :  { %1100 = vmatpush3.bf16.msra.mxu1 %v1171_v2 }
 0x1a4   :  { %1101 = vmatprep.subr.bf16.mxu1 %v1372_v0 }
 0x1a7   :  { %1102 = vmatpush3.bf16.msra.mxu1 %v1172_v3 }
 0x1a8   :  { %1103 = vmatprep.subr.bf16.mxu1 %v1372_v0 }
 0x1ab   :  { %1104 = vmatpush3.bf16.msra.mxu1 %v1173_v4 }
 0x1ac   :  { %1105 = vmatprep.subr.bf16.mxu1 %v1372_v0 }
 0x1af   :  { %1106 = vmatpush3.bf16.msra.mxu1 %v1174_v5 }
 0x1b0   :  { %1107 = vmatprep.subr.bf16.mxu1 %v1372_v0 }
 0x1b3   :  { %1108 = vmatpush3.bf16.msra.mxu1 %v1175_v27 }
 0x1b4   :  { %1109 = vmatprep.subr.bf16.mxu1 %v1372_v0  ;;  %v923_v0 = vld [vmem:[%s1676_s12] ss:$0 sm:$0xff] }
 0x1b7   :  { %1110 = vmatpush3.bf16.msra.mxu1 %v1176_v28 }
 0x24d   :  { %v369_v6 = vpop.f32.mrb[0].mxu1 }
 0x24e   :  { %v1033_v7 = vpop.f32.mrb[1].mxu1  ;;  %v370_v12 = vadd.f32 %v886_v10, %v369_v6 }
 0x24f   :  { %v372_v8 = vpop.f32.mrb[2].mxu1 }
 0x250   :  { %v1034_v9 = vpop.f32.mrb[3].mxu1  ;;  %v373_v14 = vadd.f32 %v886_v10, %v372_v8  ;;  %v376_v18 = vmax.f32 %v370_v12, 0.0 }
 0x252   :  { %v377_v22 = vmax.f32 %v373_v14, 0.0 }
 0x26d   :  { %v607_v13 = vpop.f32.mrb[4].mxu1 }
 0x26e   :  { %v608_v15 = vadd.f32 %v905_v11, %v607_v13  ;;  %v1073_v16 = vpop.f32.mrb[5].mxu1 }
 0x26f   :  { %v610_v17 = vpop.f32.mrb[6].mxu1 }
 0x270   :  { %v614_v19 = vmax.f32 %v608_v15, 0.0  ;;  %v611_v20 = vadd.f32 %v905_v11, %v610_v17  ;;  %v1074_v21 = vpop.f32.mrb[7].mxu1 }
 0x272   :  { %v616_v23 = vadd.f32 %v614_v19, %v376_v18  ;;  %v615_v24 = vmax.f32 %v611_v20, 0.0 }
 0x274   :  { %v617_v25 = vadd.f32 %v615_v24, %v377_v22 }
 0x276   :  { %v618_v26 = vpack.c.bf16 %v617_v25, %v616_v23 }
 0x278   :  { %1092 = vmatmul.mubr.bf16.vlgmr.msra.gmra.mrb[8].mxu0 %v618_v26 }
 0x34b   :  { %v724_v30 = vpop.f32.mrb[8].mxu0 }
 0x34c   :  { %v725_v31 = vadd.f32 %v914_v29, %v724_v30  ;;  %v1093_v32 = vpop.f32.mrb[9].mxu0 }
 0x34d   :  { %v727_v33 = vpop.f32.mrb[10].mxu0 }
 0x34e   :  { %v728_v34 = vadd.f32 %v914_v29, %v727_v33  ;;  %v1094_v35 = vpop.f32.mrb[11].mxu0  ;;  %v731_v36 = vmax.f32 %v725_v31, 0.0 }
 0x350   :  { %v732_v37 = vmax.f32 %v728_v34, 0.0 }
 0x352   :  { %v733_v38 = vpack.c.bf16 %v732_v37, %v731_v36 }
 0x354   :  { %1112 = vmatmul.mubr.bf16.vlgmr.msra.gmra.mrb[8].mxu1 %v733_v38 }
 0x427   :  { %v839_v39 = vpop.f32.mrb[8].mxu1 }
 0x428   :  { %v1113_v40 = vpop.f32.mrb[9].mxu1  ;;  %v840_v42 = vadd.f32 %v923_v0, %v839_v39 }
 0x429   :  { %v842_v41 = vpop.f32.mrb[10].mxu1 }
 0x42a   :  { %v843_v43 = vadd.f32 %v923_v0, %v842_v41  ;;  %v1114_v44 = vpop.f32.mrb[11].mxu1 }
 0x42c   :  { %v939_v45 = vpack.c.bf16 %v843_v43, %v840_v42 }
 0x42e   :  { %940 = vst [vmem:[#allocation14] sm:$0xff] %v939_v45  }
 0x42f   :  { %1342 = shalt.err (!%p1339_p4)
}
 0x430   :  { %s1343_s15 = scalar_lea.hbm %s1677_s13, 128 }
 0x431   :  { %p1344_p5 = scmp.ne.s32.totalorder %s1677_s13, %s1343_s15  ;;  %p1347_p6 = scmp.lt.u32.totalorder %s1343_s15, %s1677_s13 }
 0x433   :  { %p1349_p7 = pnand %p1347_p6, %p1344_p5 }
 0x435   :  { %1352 = shalt.err (!%p1349_p7)
}
 0x436   :  { %867 = dma.vmem_to_hbm [thread:$0]  %s862_s29, 128, %s1677_s13, [#allocation4], %s1365_s20, %s1365_s20, %s1366_s21  }
 0x437   :  { %1361 = dma.done.wait [#allocation4], 128  }
 0x438   :  { %1362 = vsyncadd [#allocation4], 4294967168 }
 0x439   :  { %871 = vsyncpa [#allocation3], 1 }
 0x43a   :  { %872 = vsyncpa [#allocation6], 1 }
 0x43b   :  { %873 = vsyncpa [#allocation9], 1 }
 0x43c   :  { %874 = vsyncpa [#allocation12], 1 }
 0x43d   :  { %875 = vsyncpa [#allocation4], 1 }

// kernel: tpu_custom_call.1
= control target key start
LH: loop header
LB: loop body
LE: loop exit
PB: predicated region body
PF: predicated region fallthrough
CT: control target
= control target key end

     0   :  { %18 = vsyncpa [#allocation3], 0  ;;  %s1664_s0 = inlined_call_operand.hbm [shape: bf16[2,16,128], index: 0, kind: input, shape index: {}]   ;;  %s1665_s1 = inlined_call_operand.hbm [shape: bf16[128,128], index: 1, kind: input, shape index: {}]   ;;  %s1666_s2 = inlined_call_operand.vmem [shape: f32[1,128], index: 2, kind: input, shape index: {}]   ;;  %s1667_s3 = inlined_call_operand.hbm [shape: bf16[128,128], index: 3, kind: input, shape index: {}]   ;;  %s1668_s4 = inlined_call_operand.vmem [shape: f32[1,128], index: 4, kind: input, shape index: {}]   ;;  %s1669_s5 = inlined_call_operand.hbm [shape: bf16[128,128], index: 5, kind: input, shape index: {}]   ;;  %s1670_s6 = inlined_call_operand.vmem [shape: f32[1,128], index: 6, kind: input, shape index: {}]   ;;  %s1671_s7 = inlined_call_operand.hbm [shape: bf16[128,128], index: 7, kind: input, shape index: {}]   ;;  %s1672_s8 = inlined_call_operand.vmem [shape: f32[1,128], index: 8, kind: input, shape index: {}]   ;;  %s1673_s9 = inlined_call_operand.hbm [shape: bf16[128,128], index: 9, kind: input, shape index: {}]   ;;  %s1674_s10 = inlined_call_operand.vmem [shape: f32[1,128], index: 10, kind: input, shape index: {}]   ;;  %s1675_s11 = inlined_call_operand.hbm [shape: bf16[128,128], index: 11, kind: input, shape index: {}]   ;;  %s1676_s12 = inlined_call_operand.vmem [shape: f32[1,128], index: 12, kind: input, shape index: {}]   ;;  %s1677_s13 = inlined_call_operand.hbm [shape: bf16[16,128], index: 13, kind: output, shape index: {}]  }
   0x1   :  { %19 = vsyncpa [#allocation6], 0 }
   0x2   :  { %20 = vsyncpa [#allocation9], 0 }
   0x3   :  { %21 = vsyncpa [#allocation12], 0 }
   0x4   :  { %22 = vsyncpa [#allocation4], 0  ;;  %s1363_s25 = smov [#allocation5]   ;;  %s1364_s27 = smov [#allocation8]  }
   0x5   :  { %s40_s26 = sshll.u32 %s1363_s25, 4  ;;  %s68_s28 = sshll.u32 %s1364_s27, 4  ;;  %s41_s26 = int_to_ptr.vmem [resolvable:$true] %s40_s26  ;;  %s1445_s28 = int_to_ptr.vmem [resolvable:$true] %s68_s28 }
   0x6   :  { %s1177_s14 = scalar_lea.hbm %s1665_s1, 1024 }
   0x7   :  { %p1178_p0 = scmp.ne.s32.totalorder %s1665_s1, %s1177_s14  ;;  %p1181_p1 = scmp.lt.u32.totalorder %s1177_s14, %s1665_s1 }
   0x9   :  { %p1183_p2 = pnand %p1181_p1, %p1178_p0 }
   0xb   :  { %1186 = shalt.err (!%p1183_p2)
}
   0xc   :  { %s1187_s19 = scalar_lea.vmem %s41_s26, 1024  ;;  %p1192_p4 = scmp.lt.s32.totalorder %s41_s26, %s41_s26 }
   0xd   :  { %p1188_p3 = scmp.ne.s32.totalorder %s41_s26, %s1187_s19  ;;  %p1193_p5 = scmp.lt.s32.totalorder %s1187_s19, %s1187_s19 }
   0xf   :  { %p1194_p6 = por %p1193_p5, %p1192_p4 }
  0x11   :  { %p1195_p7 = pnand %p1194_p6, %p1188_p3 }
  0x13   :  { %1198 = shalt.err (!%p1195_p7)
}
  0x14   :  { %s1365_s20 = smov 64   ;;  %s1366_s21 = smov 4  }
  0x15   :  { %46 = dma.hbm_to_vmem [thread:$0]  %s1665_s1, 1024, %s41_s26, [#allocation6], %s1365_s20, %s1365_s20, %s1366_s21  }
  0x16   :  { %s1199_s27 = scalar_lea.hbm %s1669_s5, 1024 }
  0x17   :  { %p1200_p8 = scmp.ne.s32.totalorder %s1669_s5, %s1199_s27  ;;  %p1203_p9 = scmp.lt.u32.totalorder %s1199_s27, %s1669_s5 }
  0x19   :  { %p1205_p10 = pnand %p1203_p9, %p1200_p8 }
  0x1b   :  { %1208 = shalt.err (!%p1205_p10)
}
  0x1c   :  { %s1209_s16 = scalar_lea.vmem %s1445_s28, 1024  ;;  %p1214_p12 = scmp.lt.s32.totalorder %s1445_s28, %s1445_s28 }
  0x1d   :  { %p1210_p11 = scmp.ne.s32.totalorder %s1445_s28, %s1209_s16  ;;  %p1215_p13 = scmp.lt.s32.totalorder %s1209_s16, %s1209_s16 }
  0x1f   :  { %p1216_p0 = por %p1215_p13, %p1214_p12 }
  0x21   :  { %p1217_p1 = pnand %p1216_p0, %p1210_p11 }
  0x23   :  { %1220 = shalt.err (!%p1217_p1)
}
  0x24   :  { %74 = dma.hbm_to_vmem [thread:$0]  %s1669_s5, 1024, %s1445_s28, [#allocation9], %s1365_s20, %s1365_s20, %s1366_s21  }
  0x25   :  { %s1367_s17 = smov [#allocation11]   ;;  %s1368_s19 = smov [#allocation2]  }
  0x26   :  { %s96_s18 = sshll.u32 %s1367_s17, 4  ;;  %s28_s22 = sshll.u32 %s1368_s19, 4  ;;  %s97_s18 = int_to_ptr.vmem [resolvable:$true] %s96_s18  ;;  %s1482_s22 = int_to_ptr.vmem [resolvable:$true] %s28_s22 }
  0x27   :  { %s1221_s25 = scalar_lea.hbm %s1673_s9, 1024 }
  0x28   :  { %p1222_p2 = scmp.ne.s32.totalorder %s1673_s9, %s1221_s25  ;;  %p1225_p3 = scmp.lt.u32.totalorder %s1221_s25, %s1673_s9 }
  0x2a   :  { %p1227_p4 = pnand %p1225_p3, %p1222_p2 }
  0x2c   :  { %1230 = shalt.err (!%p1227_p4)
}
  0x2d   :  { %s1231_s5 = scalar_lea.vmem %s97_s18, 1024  ;;  %p1236_p6 = scmp.lt.s32.totalorder %s97_s18, %s97_s18 }
  0x2e   :  { %p1232_p5 = scmp.ne.s32.totalorder %s97_s18, %s1231_s5  ;;  %p1237_p7 = scmp.lt.s32.totalorder %s1231_s5, %s1231_s5 }
  0x30   :  { %p1238_p8 = por %p1237_p7, %p1236_p6 }
  0x32   :  { %p1239_p9 = pnand %p1238_p8, %p1232_p5 }
  0x34   :  { %1242 = shalt.err (!%p1239_p9)
}
  0x35   :  { %102 = dma.hbm_to_vmem [thread:$0]  %s1673_s9, 1024, %s97_s18, [#allocation12], %s1365_s20, %s1365_s20, %s1366_s21  }
  0x36   :  { %s1243_s26 = scalar_lea.hbm %s1664_s0, 256 }
  0x37   :  { %p1244_p10 = scmp.ne.s32.totalorder %s1664_s0, %s1243_s26  ;;  %p1247_p11 = scmp.lt.u32.totalorder %s1243_s26, %s1664_s0 }
  0x39   :  { %p1249_p12 = pnand %p1247_p11, %p1244_p10 }
  0x3b   :  { %1252 = shalt.err (!%p1249_p12)
}
  0x3c   :  { %s1253_s25 = scalar_lea.vmem %s1482_s22, 256  ;;  %p1258_p0 = scmp.lt.s32.totalorder %s1482_s22, %s1482_s22 }
  0x3d   :  { %p1254_p13 = scmp.ne.s32.totalorder %s1482_s22, %s1253_s25  ;;  %p1259_p1 = scmp.lt.s32.totalorder %s1253_s25, %s1253_s25 }
  0x3f   :  { %p1260_p2 = por %p1259_p1, %p1258_p0 }
  0x41   :  { %p1261_p3 = pnand %p1260_p2, %p1254_p13 }
  0x43   :  { %1264 = shalt.err (!%p1261_p3)
}
  0x44   :  { %34 = dma.hbm_to_vmem [thread:$0]  %s1664_s0, 256, %s1482_s22, [#allocation3], %s1365_s20, %s1365_s20, %s1366_s21  }
  0x45   :  { %s1369_s27 = smov [#allocation7]   ;;  %s1370_s30 = smov [#allocation10]  }
  0x46   :  { %s54_s29 = sshll.u32 %s1369_s27, 4  ;;  %s82_s14 = sshll.u32 %s1370_s30, 4  ;;  %s55_s29 = int_to_ptr.vmem [resolvable:$true] %s54_s29  ;;  %s1519_s14 = int_to_ptr.vmem [resolvable:$true] %s82_s14 }
  0x47   :  { %s1265_s15 = scalar_lea.hbm %s1667_s3, 1024 }
  0x48   :  { %p1266_p4 = scmp.ne.s32.totalorder %s1667_s3, %s1265_s15  ;;  %p1269_p5 = scmp.lt.u32.totalorder %s1265_s15, %s1667_s3 }
  0x4a   :  { %p1271_p6 = pnand %p1269_p5, %p1266_p4 }
  0x4c   :  { %1274 = shalt.err (!%p1271_p6)
}
  0x4d   :  { %s1275_s0 = scalar_lea.vmem %s55_s29, 1024  ;;  %p1280_p8 = scmp.lt.s32.totalorder %s55_s29, %s55_s29 }
  0x4e   :  { %p1276_p7 = scmp.ne.s32.totalorder %s55_s29, %s1275_s0  ;;  %p1281_p9 = scmp.lt.s32.totalorder %s1275_s0, %s1275_s0 }
  0x50   :  { %p1282_p10 = por %p1281_p9, %p1280_p8 }
  0x52   :  { %p1283_p11 = pnand %p1282_p10, %p1276_p7 }
  0x54   :  { %1286 = shalt.err (!%p1283_p11)
}
  0x55   :  { %60 = dma.hbm_to_vmem [thread:$0]  %s1667_s3, 1024, %s55_s29, [#allocation6], %s1365_s20, %s1365_s20, %s1366_s21  }
  0x56   :  { %s1287_s25 = scalar_lea.hbm %s1671_s7, 1024 }
  0x57   :  { %p1288_p12 = scmp.ne.s32.totalorder %s1671_s7, %s1287_s25  ;;  %p1291_p13 = scmp.lt.u32.totalorder %s1287_s25, %s1671_s7 }
  0x59   :  { %p1293_p0 = pnand %p1291_p13, %p1288_p12 }
  0x5b   :  { %1296 = shalt.err (!%p1293_p0)
}
  0x5c   :  { %s1297_s5 = scalar_lea.vmem %s1519_s14, 1024  ;;  %p1302_p2 = scmp.lt.s32.totalorder %s1519_s14, %s1519_s14 }
  0x5d   :  { %p1298_p1 = scmp.ne.s32.totalorder %s1519_s14, %s1297_s5  ;;  %p1303_p3 = scmp.lt.s32.totalorder %s1297_s5, %s1297_s5 }
  0x5f   :  { %p1304_p4 = por %p1303_p3, %p1302_p2 }
  0x61   :  { %p1305_p5 = pnand %p1304_p4, %p1298_p1 }
  0x63   :  { %1308 = shalt.err (!%p1305_p5)
}
  0x64   :  { %88 = dma.hbm_to_vmem [thread:$0]  %s1671_s7, 1024, %s1519_s14, [#allocation9], %s1365_s20, %s1365_s20, %s1366_s21  }
  0x65   :  { %s1371_s28 = smov [#allocation13]   ;;  %s1309_s26 = scalar_lea.hbm %s1675_s11, 1024 }
  0x66   :  { %s110_s15 = sshll.u32 %s1371_s28, 4  ;;  %p1310_p6 = scmp.ne.s32.totalorder %s1675_s11, %s1309_s26  ;;  %s111_s15 = int_to_ptr.vmem [resolvable:$true] %s110_s15 }
  0x67   :  { %p1313_p7 = scmp.lt.u32.totalorder %s1309_s26, %s1675_s11 }
  0x69   :  { %p1315_p8 = pnand %p1313_p7, %p1310_p6 }
  0x6b   :  { %1318 = shalt.err (!%p1315_p8)
}
  0x6c   :  { %s1319_s23 = scalar_lea.vmem %s111_s15, 1024  ;;  %p1324_p10 = scmp.lt.s32.totalorder %s111_s15, %s111_s15 }
  0x6d   :  { %p1320_p9 = scmp.ne.s32.totalorder %s111_s15, %s1319_s23  ;;  %p1325_p11 = scmp.lt.s32.totalorder %s1319_s23, %s1319_s23 }
  0x6f   :  { %p1326_p12 = por %p1325_p11, %p1324_p10 }
  0x71   :  { %p1327_p13 = pnand %p1326_p12, %p1320_p9 }
  0x73   :  { %1330 = shalt.err (!%p1327_p13)
}
  0x74   :  { %116 = dma.hbm_to_vmem [thread:$0]  %s1675_s11, 1024, %s111_s15, [#allocation12], %s1365_s20, %s1365_s20, %s1366_s21  }
  0x75   :  { %1353 = dma.done.wait [#allocation3], 256  }
  0x76   :  { %1354 = vsyncadd [#allocation3], 4294967040 }
  0x77   :  { %1355 = dma.done.wait [#allocation6], 2048  }
  0x78   :  { %1356 = vsyncadd [#allocation6], 4294965248 }
  0x79   :  { %1357 = dma.done.wait [#allocation9], 2048  }
  0x7a   :  { %1358 = vsyncadd [#allocation9], 4294965248 }
  0x7b   :  { %1359 = dma.done.wait [#allocation12], 2048  }
  0x7c   :  { %1360 = vsyncadd [#allocation12], 4294965248  ;;  %v1372_v0 = vmov 0.0   ;;  %vm1373_vm0 = vmmov 0   ;;  %v1127_v1 = vld [vmem:[#allocation5] sm:$0xff]   ;;  %v1128_v2 = vld [vmem:[#allocation5 + $0x8] sm:$0xff]  }
  0x7d   :  { %995 = vmatprep.subr.bf16.mxu0 %v1372_v0  ;;  %1011 = vmatprep.mubr.msk.bf16.mxu0 %vm1373_vm0, %v1372_v0  ;;  %v1129_v3 = vld [vmem:[#allocation5 + $0x10] sm:$0xff]   ;;  %v1130_v4 = vld [vmem:[#allocation5 + $0x18] sm:$0xff]   ;;  %v1131_v5 = vld [vmem:[#allocation5 + $0x20] sm:$0xff]   ;;  %s1374_s3 = smov [#allocation14]  }
  0x7e   :  { %1015 = vmatprep.subr.bf16.mxu1 %v1372_v0  ;;  %1031 = vmatprep.mubr.msk.bf16.mxu1 %vm1373_vm0, %v1372_v0  ;;  %v1132_v6 = vld [vmem:[#allocation5 + $0x28] sm:$0xff]   ;;  %v1145_v7 = vld [vmem:[#allocation7] sm:$0xff]   ;;  %v1133_v9 = vld [vmem:[#allocation5 + $0x30] sm:$0xff]   ;;  %s861_s29 = sshll.u32 %s1374_s3, 4  ;;  %s862_s29 = int_to_ptr.vmem [resolvable:$true] %s861_s29 }
  0x7f   :  { %996 = vmatpush3.bf16.msra.mxu0 %v1127_v1  ;;  %1016 = vmatpush3.bf16.msra.mxu1 %v1145_v7  ;;  %v1146_v8 = vld [vmem:[#allocation7 + $0x8] sm:$0xff]   ;;  %v1134_v10 = vld [vmem:[#allocation5 + $0x38] sm:$0xff]   ;;  %v1147_v11 = vld [vmem:[#allocation7 + $0x10] sm:$0xff]   ;;  %p1336_p1 = scmp.lt.s32.totalorder %s862_s29, %s862_s29 }
  0x80   :  { %997 = vmatprep.subr.bf16.mxu0 %v1372_v0  ;;  %1017 = vmatprep.subr.bf16.mxu1 %v1372_v0  ;;  %v1148_v12 = vld [vmem:[#allocation7 + $0x18] sm:$0xff]   ;;  %v1135_v13 = vld [vmem:[#allocation2] sm:$0xff]   ;;  %v1136_v14 = vld [vmem:[#allocation8] sm:$0xff]  }
  0x81   :  { %v1149_v15 = vld [vmem:[#allocation7 + $0x20] sm:$0xff]   ;;  %v1137_v16 = vld [vmem:[#allocation8 + $0x8] sm:$0xff]   ;;  %v1138_v18 = vld [vmem:[#allocation8 + $0x10] sm:$0xff]  }
  0x82   :  { %v1150_v17 = vld [vmem:[#allocation7 + $0x28] sm:$0xff]   ;;  %v1139_v19 = vld [vmem:[#allocation8 + $0x18] sm:$0xff]   ;;  %v1140_v20 = vld [vmem:[#allocation8 + $0x20] sm:$0xff]  }
  0x83   :  { %998 = vmatpush3.bf16.msra.mxu0 %v1128_v2  ;;  %1018 = vmatpush3.bf16.msra.mxu1 %v1146_v8  ;;  %v1141_v21 = vld [vmem:[#allocation8 + $0x28] sm:$0xff]   ;;  %v1142_v22 = vld [vmem:[#allocation8 + $0x30] sm:$0xff]   ;;  %v1143_v23 = vld [vmem:[#allocation8 + $0x38] sm:$0xff]  }
  0x84   :  { %999 = vmatprep.subr.bf16.mxu0 %v1372_v0  ;;  %1019 = vmatprep.subr.bf16.mxu1 %v1372_v0  ;;  %v1144_v24 = vld [vmem:[#allocation2 + $0x8] sm:$0xff]   ;;  %v1151_v25 = vld [vmem:[#allocation7 + $0x30] sm:$0xff]   ;;  %v1153_v36 = vld [vmem:[#allocation10] sm:$0xff]  }
  0x85   :  { %v1152_v26 = vld [vmem:[#allocation7 + $0x38] sm:$0xff]   ;;  %v876_v27 = vld [vmem:[%s1666_s2] ss:$0 sm:$0xff]  ;;  %v1154_v38 = vld [vmem:[#allocation10 + $0x8] sm:$0xff]  }
  0x86   :  { %v1155_v39 = vld [vmem:[#allocation10 + $0x10] sm:$0xff]   ;;  %v1156_v40 = vld [vmem:[#allocation10 + $0x18] sm:$0xff]   ;;  %v1157_v41 = vld [vmem:[#allocation10 + $0x20] sm:$0xff]  }
  0x87   :  { %1000 = vmatpush3.bf16.msra.mxu0 %v1129_v3  ;;  %1020 = vmatpush3.bf16.msra.mxu1 %v1147_v11  ;;  %v1158_v42 = vld [vmem:[#allocation10 + $0x28] sm:$0xff]   ;;  %v895_v43 = vld [vmem:[%s1670_s6] ss:$0 sm:$0xff]  ;;  %v1160_v49 = vld [vmem:[#allocation10 + $0x38] sm:$0xff]  }
  0x88   :  { %1001 = vmatprep.subr.bf16.mxu0 %v1372_v0  ;;  %1021 = vmatprep.subr.bf16.mxu1 %v1372_v0  ;;  %v1159_v44 = vld [vmem:[#allocation10 + $0x30] sm:$0xff]   ;;  %v1161_v55 = vld [vmem:[#allocation11] sm:$0xff]   ;;  %v1162_v56 = vld [vmem:[#allocation11 + $0x8] sm:$0xff]  }
  0x89   :  { %v1163_v57 = vld [vmem:[#allocation11 + $0x10] sm:$0xff]   ;;  %v1164_v58 = vld [vmem:[#allocation11 + $0x18] sm:$0xff]   ;;  %v1165_v59 = vld [vmem:[#allocation11 + $0x20] sm:$0xff]  }
  0x8a   :  { %v1166_v60 = vld [vmem:[#allocation11 + $0x28] sm:$0xff]   ;;  %v1167_v61 = vld [vmem:[#allocation11 + $0x30] sm:$0xff]   ;;  %v1168_v62 = vld [vmem:[#allocation11 + $0x38] sm:$0xff]  }
  0x8b   :  { %1002 = vmatpush3.bf16.msra.mxu0 %v1130_v4  ;;  %1022 = vmatpush3.bf16.msra.mxu1 %v1148_v12  ;;  %v1169_v63 = vld [vmem:[#allocation13] sm:$0xff]   ;;  %v1170_v1 = vld [vmem:[#allocation13 + $0x8] sm:$0xff]   ;;  %v1171_v2 = vld [vmem:[#allocation13 + $0x10] sm:$0xff]  }
  0x8c   :  { %1003 = vmatprep.subr.bf16.mxu0 %v1372_v0  ;;  %1023 = vmatprep.subr.bf16.mxu1 %v1372_v0  ;;  %v1172_v3 = vld [vmem:[#allocation13 + $0x18] sm:$0xff]   ;;  %v1173_v4 = vld [vmem:[#allocation13 + $0x20] sm:$0xff]   ;;  %v905_v11 = vld [vmem:[%s1672_s8] ss:$0 sm:$0xff] }
  0x8f   :  { %1004 = vmatpush3.bf16.msra.mxu0 %v1131_v5  ;;  %1024 = vmatpush3.bf16.msra.mxu1 %v1149_v15  ;;  %v1174_v5 = vld [vmem:[#allocation13 + $0x28] sm:$0xff]  }
  0x90   :  { %1005 = vmatprep.subr.bf16.mxu0 %v1372_v0  ;;  %1025 = vmatprep.subr.bf16.mxu1 %v1372_v0 }
  0x93   :  { %1006 = vmatpush3.bf16.msra.mxu0 %v1132_v6  ;;  %1026 = vmatpush3.bf16.msra.mxu1 %v1150_v17 }
  0x94   :  { %1007 = vmatprep.subr.bf16.mxu0 %v1372_v0  ;;  %1027 = vmatprep.subr.bf16.mxu1 %v1372_v0 }
  0x97   :  { %1008 = vmatpush3.bf16.msra.mxu0 %v1133_v9  ;;  %1028 = vmatpush3.bf16.msra.mxu1 %v1151_v25 }
  0x98   :  { %1009 = vmatprep.subr.bf16.mxu0 %v1372_v0  ;;  %1029 = vmatprep.subr.bf16.mxu1 %v1372_v0 }
  0x9b   :  { %1010 = vmatpush3.bf16.msra.mxu0 %v1134_v10  ;;  %1030 = vmatpush3.bf16.msra.mxu1 %v1152_v26  ;;  %v886_v10 = vld [vmem:[%s1668_s4] ss:$0 sm:$0xff] }
  0x9c   :  { %1035 = vmatprep.subr.bf16.mxu0 %v1372_v0  ;;  %1055 = vmatprep.subr.bf16.mxu1 %v1372_v0 }
  0x9e   :  { %1012 = vmatmul.mubr.bf16.vlgmr.msra.gmra.mrb[0].mxu0 %v1135_v13 }
  0x9f   :  { %1036 = vmatpush3.bf16.msra.mxu0 %v1136_v14  ;;  %1051 = vmatprep.mubr.msk.bf16.mxu0 %vm1373_vm0, %v1372_v0 }
  0xa0   :  { %1037 = vmatprep.subr.bf16.mxu0 %v1372_v0 }
  0xa3   :  { %1038 = vmatpush3.bf16.msra.mxu0 %v1137_v16 }
  0xa4   :  { %1039 = vmatprep.subr.bf16.mxu0 %v1372_v0 }
  0xa7   :  { %1040 = vmatpush3.bf16.msra.mxu0 %v1138_v18 }
  0xa8   :  { %1041 = vmatprep.subr.bf16.mxu0 %v1372_v0 }
  0xab   :  { %1042 = vmatpush3.bf16.msra.mxu0 %v1139_v19 }
  0xac   :  { %1043 = vmatprep.subr.bf16.mxu0 %v1372_v0 }
  0xaf   :  { %1044 = vmatpush3.bf16.msra.mxu0 %v1140_v20 }
  0xb0   :  { %1045 = vmatprep.subr.bf16.mxu0 %v1372_v0 }
  0xb3   :  { %1046 = vmatpush3.bf16.msra.mxu0 %v1141_v21 }
  0xb4   :  { %1047 = vmatprep.subr.bf16.mxu0 %v1372_v0 }
  0xb7   :  { %1048 = vmatpush3.bf16.msra.mxu0 %v1142_v22 }
  0xb8   :  { %1049 = vmatprep.subr.bf16.mxu0 %v1372_v0 }
  0xbb   :  { %1050 = vmatpush3.bf16.msra.mxu0 %v1143_v23 }
  0xbc   :  { %1075 = vmatprep.subr.bf16.mxu0 %v1372_v0 }
  0xbe   :  { %1052 = vmatmul.mubr.bf16.vlgmr.msra.gmra.mrb[4].mxu0 %v1144_v24 }
  0xbf   :  { %1091 = vmatprep.mubr.msk.bf16.mxu0 %vm1373_vm0, %v1372_v0  ;;  %1076 = vmatpush3.bf16.msra.mxu0 %v1161_v55 }
  0xc0   :  { %1077 = vmatprep.subr.bf16.mxu0 %v1372_v0 }
  0xc3   :  { %1078 = vmatpush3.bf16.msra.mxu0 %v1162_v56 }
  0xc4   :  { %1079 = vmatprep.subr.bf16.mxu0 %v1372_v0 }
  0xc7   :  { %1080 = vmatpush3.bf16.msra.mxu0 %v1163_v57 }
  0xc8   :  { %1081 = vmatprep.subr.bf16.mxu0 %v1372_v0 }
  0xcb   :  { %1082 = vmatpush3.bf16.msra.mxu0 %v1164_v58 }
  0xcc   :  { %1083 = vmatprep.subr.bf16.mxu0 %v1372_v0 }
  0xcf   :  { %1084 = vmatpush3.bf16.msra.mxu0 %v1165_v59 }
  0xd0   :  { %1085 = vmatprep.subr.bf16.mxu0 %v1372_v0 }
  0xd3   :  { %1086 = vmatpush3.bf16.msra.mxu0 %v1166_v60 }
  0xd4   :  { %1087 = vmatprep.subr.bf16.mxu0 %v1372_v0 }
  0xd7   :  { %1088 = vmatpush3.bf16.msra.mxu0 %v1167_v61 }
  0xd8   :  { %1089 = vmatprep.subr.bf16.mxu0 %v1372_v0 }
  0xdb   :  { %1090 = vmatpush3.bf16.msra.mxu0 %v1168_v62 }
 0x171   :  { %v254_v28 = vpop.f32.mrb[0].mxu0 }
 0x172   :  { %v255_v29 = vadd.f32 %v876_v27, %v254_v28  ;;  %v1013_v30 = vpop.f32.mrb[1].mxu0  ;;  %v1176_v28 = vld [vmem:[#allocation13 + $0x38] sm:$0xff]  }
 0x173   :  { %v257_v31 = vpop.f32.mrb[2].mxu0 }
 0x174   :  { %v261_v32 = vmax.f32 %v255_v29, 0.0  ;;  %v258_v33 = vadd.f32 %v876_v27, %v257_v31  ;;  %v1014_v34 = vpop.f32.mrb[3].mxu0  ;;  %v1175_v27 = vld [vmem:[#allocation13 + $0x30] sm:$0xff]  }
 0x175   :  { %v914_v29 = vld [vmem:[%s1674_s10] ss:$0 sm:$0xff]  ;;  %s1331_s10 = scalar_lea.vmem %s862_s29, 128 }
 0x176   :  { %v262_v35 = vmax.f32 %v258_v33, 0.0  ;;  %p1332_p0 = scmp.ne.s32.totalorder %s862_s29, %s1331_s10  ;;  %p1337_p2 = scmp.lt.s32.totalorder %s1331_s10, %s1331_s10 }
 0x178   :  { %v263_v37 = vpack.c.bf16 %v262_v35, %v261_v32  ;;  %p1338_p3 = por %p1337_p2, %p1336_p1 }
 0x17a   :  { %1032 = vmatmul.mubr.bf16.vlgmr.msra.gmra.mrb[0].mxu1 %v263_v37  ;;  %p1339_p4 = pnand %p1338_p3, %p1332_p0 }
 0x17b   :  { %1056 = vmatpush3.bf16.msra.mxu1 %v1153_v36  ;;  %1071 = vmatprep.mubr.msk.bf16.mxu1 %vm1373_vm0, %v1372_v0 }
 0x17c   :  { %1057 = vmatprep.subr.bf16.mxu1 %v1372_v0 }
 0x17f   :  { %1058 = vmatpush3.bf16.msra.mxu1 %v1154_v38 }
 0x180   :  { %1059 = vmatprep.subr.bf16.mxu1 %v1372_v0 }
 0x183   :  { %1060 = vmatpush3.bf16.msra.mxu1 %v1155_v39 }
 0x184   :  { %1061 = vmatprep.subr.bf16.mxu1 %v1372_v0 }
 0x187   :  { %1062 = vmatpush3.bf16.msra.mxu1 %v1156_v40 }
 0x188   :  { %1063 = vmatprep.subr.bf16.mxu1 %v1372_v0 }
 0x18b   :  { %1064 = vmatpush3.bf16.msra.mxu1 %v1157_v41 }
 0x18c   :  { %1065 = vmatprep.subr.bf16.mxu1 %v1372_v0 }
 0x18f   :  { %1066 = vmatpush3.bf16.msra.mxu1 %v1158_v42 }
 0x190   :  { %1067 = vmatprep.subr.bf16.mxu1 %v1372_v0 }
 0x191   :  { %v492_v45 = vpop.f32.mrb[4].mxu0 }
 0x192   :  { %v493_v46 = vadd.f32 %v895_v43, %v492_v45  ;;  %v1053_v47 = vpop.f32.mrb[5].mxu0 }
 0x193   :  { %v495_v48 = vpop.f32.mrb[6].mxu0  ;;  %1068 = vmatpush3.bf16.msra.mxu1 %v1159_v44 }
 0x194   :  { %v496_v50 = vadd.f32 %v895_v43, %v495_v48  ;;  %v1054_v51 = vpop.f32.mrb[7].mxu0  ;;  %1069 = vmatprep.subr.bf16.mxu1 %v1372_v0  ;;  %v499_v52 = vmax.f32 %v493_v46, 0.0 }
 0x196   :  { %v500_v53 = vmax.f32 %v496_v50, 0.0 }
 0x197   :  { %1070 = vmatpush3.bf16.msra.mxu1 %v1160_v49 }
 0x198   :  { %v501_v54 = vpack.c.bf16 %v500_v53, %v499_v52  ;;  %1095 = vmatprep.subr.bf16.mxu1 %v1372_v0 }
 0x19a   :  { %1072 = vmatmul.mubr.bf16.vlgmr.msra.gmra.mrb[4].mxu1 %v501_v54 }
 0x19b   :  { %1111 = vmatprep.mubr.msk.bf16.mxu1 %vm1373_vm0, %v1372_v0  ;;  %1096 = vmatpush3.bf16.msra.mxu1 %v1169_v63 }
 0x19c   :  { %1097 = vmatprep.subr.bf16.mxu1 %v1372_v0 }
 0x19f   :  { %1098 = vmatpush3.bf16.msra.mxu1 %v1170_v1 }
 0x1a0   :  { %1099 = vmatprep.subr.bf16.mxu1 %v1372_v0 }
 0x1a3   :  { %1100 = vmatpush3.bf16.msra.mxu1 %v1171_v2 }
 0x1a4   :  { %1101 = vmatprep.subr.bf16.mxu1 %v1372_v0 }
 0x1a7   :  { %1102 = vmatpush3.bf16.msra.mxu1 %v1172_v3 }
 0x1a8   :  { %1103 = vmatprep.subr.bf16.mxu1 %v1372_v0 }
 0x1ab   :  { %1104 = vmatpush3.bf16.msra.mxu1 %v1173_v4 }
 0x1ac   :  { %1105 = vmatprep.subr.bf16.mxu1 %v1372_v0 }
 0x1af   :  { %1106 = vmatpush3.bf16.msra.mxu1 %v1174_v5 }
 0x1b0   :  { %1107 = vmatprep.subr.bf16.mxu1 %v1372_v0 }
 0x1b3   :  { %1108 = vmatpush3.bf16.msra.mxu1 %v1175_v27 }
 0x1b4   :  { %1109 = vmatprep.subr.bf16.mxu1 %v1372_v0  ;;  %v923_v0 = vld [vmem:[%s1676_s12] ss:$0 sm:$0xff] }
 0x1b7   :  { %1110 = vmatpush3.bf16.msra.mxu1 %v1176_v28 }
 0x24d   :  { %v369_v6 = vpop.f32.mrb[0].mxu1 }
 0x24e   :  { %v1033_v7 = vpop.f32.mrb[1].mxu1  ;;  %v370_v12 = vadd.f32 %v886_v10, %v369_v6 }
 0x24f   :  { %v372_v8 = vpop.f32.mrb[2].mxu1 }
 0x250   :  { %v1034_v9 = vpop.f32.mrb[3].mxu1  ;;  %v373_v14 = vadd.f32 %v886_v10, %v372_v8  ;;  %v376_v18 = vmax.f32 %v370_v12, 0.0 }
 0x252   :  { %v377_v22 = vmax.f32 %v373_v14, 0.0 }
 0x26d   :  { %v607_v13 = vpop.f32.mrb[4].mxu1 }
 0x26e   :  { %v608_v15 = vadd.f32 %v905_v11, %v607_v13  ;;  %v1073_v16 = vpop.f32.mrb[5].mxu1 }
 0x26f   :  { %v610_v17 = vpop.f32.mrb[6].mxu1 }
 0x270   :  { %v614_v19 = vmax.f32 %v608_v15, 0.0  ;;  %v611_v20 = vadd.f32 %v905_v11, %v610_v17  ;;  %v1074_v21 = vpop.f32.mrb[7].mxu1 }
 0x272   :  { %v616_v23 = vadd.f32 %v614_v19, %v376_v18  ;;  %v615_v24 = vmax.f32 %v611_v20, 0.0 }
 0x274   :  { %v617_v25 = vadd.f32 %v615_v24, %v377_v22 }
 0x276   :  { %v618_v26 = vpack.c.bf16 %v617_v25, %v616_v23 }
 0x278   :  { %1092 = vmatmul.mubr.bf16.vlgmr.msra.gmra.mrb[8].mxu0 %v618_v26 }
 0x34b   :  { %v724_v30 = vpop.f32.mrb[8].mxu0 }
 0x34c   :  { %v725_v31 = vadd.f32 %v914_v29, %v724_v30  ;;  %v1093_v32 = vpop.f32.mrb[9].mxu0 }
 0x34d   :  { %v727_v33 = vpop.f32.mrb[10].mxu0 }
 0x34e   :  { %v728_v34 = vadd.f32 %v914_v29, %v727_v33  ;;  %v1094_v35 = vpop.f32.mrb[11].mxu0  ;;  %v731_v36 = vmax.f32 %v725_v31, 0.0 }
 0x350   :  { %v732_v37 = vmax.f32 %v728_v34, 0.0 }
 0x352   :  { %v733_v38 = vpack.c.bf16 %v732_v37, %v731_v36 }
 0x354   :  { %1112 = vmatmul.mubr.bf16.vlgmr.msra.gmra.mrb[8].mxu1 %v733_v38 }
 0x427   :  { %v839_v39 = vpop.f32.mrb[8].mxu1 }
 0x428   :  { %v1113_v40 = vpop.f32.mrb[9].mxu1  ;;  %v840_v42 = vadd.f32 %v923_v0, %v839_v39 }
 0x429   :  { %v842_v41 = vpop.f32.mrb[10].mxu1 }
 0x42a   :  { %v843_v43 = vadd.f32 %v923_v0, %v842_v41  ;;  %v1114_v44 = vpop.f32.mrb[11].mxu1 }
 0x42c   :  { %v939_v45 = vpack.c.bf16 %v843_v43, %v840_v42 }
 0x42e   :  { %940 = vst [vmem:[#allocation14] sm:$0xff] %v939_v45  }
 0x42f   :  { %1342 = shalt.err (!%p1339_p4)
}
 0x430   :  { %s1343_s15 = scalar_lea.hbm %s1677_s13, 128 }
 0x431   :  { %p1344_p5 = scmp.ne.s32.totalorder %s1677_s13, %s1343_s15  ;;  %p1347_p6 = scmp.lt.u32.totalorder %s1343_s15, %s1677_s13 }
 0x433   :  { %p1349_p7 = pnand %p1347_p6, %p1344_p5 }
 0x435   :  { %1352 = shalt.err (!%p1349_p7)
}
 0x436   :  { %867 = dma.vmem_to_hbm [thread:$0]  %s862_s29, 128, %s1677_s13, [#allocation4], %s1365_s20, %s1365_s20, %s1366_s21  }
 0x437   :  { %1361 = dma.done.wait [#allocation4], 128  }
 0x438   :  { %1362 = vsyncadd [#allocation4], 4294967168 }
 0x439   :  { %871 = vsyncpa [#allocation3], 1 }
 0x43a   :  { %872 = vsyncpa [#allocation6], 1 }
 0x43b   :  { %873 = vsyncpa [#allocation9], 1 }
 0x43c   :  { %874 = vsyncpa [#allocation12], 1 }
 0x43d   :  { %875 = vsyncpa [#allocation4], 1 }

</bundles_post_ra>
